<compile_context>
chip_gen: v7x
topology: tpu7x:2x2x1
jax: 0.10.0
libtpu: 0.0.40
codegen_flags: <defaults>
</compile_context>

<pallas_src>
import functools

import numpy as np
import jax
import jax.numpy as jnp
from jax.experimental import pallas as pl
from jax.experimental.pallas import tpu as pltpu

EPS = 1e-5      # InPlaceABN eps
SLOPE = 0.01    # InPlaceABN leaky_relu activation_param


# ----------------------------- Pallas kernel -------------------------------

def _conv_bn_lrelu_kernel(x_ref, w_ref, b_ref, o_ref, *,
                          KD, KH, Do, Ho, stride, slope):
    """One batch element per grid step.

    x_ref: (1, Dp, Hp, Wp*Cin)      bf16  padded activation
    w_ref: (KD*KH, Wp*Cin, Wo*Cout) bf16  banded weight (BN scale folded in)
    b_ref: (1, Wo*Cout)             f32   BN bias, tiled per output column
    o_ref: (1, Do*Ho, Wo*Cout)      f32
    """
    WpC = x_ref.shape[-1]
    N = w_ref.shape[-1]
    M = Do * Ho

    acc = jnp.zeros((M, N), jnp.float32)
    for kd in range(KD):                       # static unrolled tap loop
        for kh in range(KH):
            slab = x_ref[0,
                         kd:kd + (Do - 1) * stride + 1,
                         kh:kh + (Ho - 1) * stride + 1, :]
            if stride > 1:
                slab = slab[::stride, ::stride, :]
            # (Do*Ho, Wp*Cin) @ (Wp*Cin, Wo*Cout) on the MXU, f32 accumulate.
            acc = acc + jnp.dot(slab.reshape(M, WpC),
                                w_ref[kd * KH + kh],
                                preferred_element_type=jnp.float32)

    y = acc + b_ref[...]                       # f32 epilogue (v5e safe)
    y = jnp.where(y >= 0.0, y, slope * y)      # LeakyReLU(0.01)
    o_ref[0] = y.astype(o_ref.dtype)


# ----------------------------- wrapper --------------------------------------

def conv_bn_relu_3d(x_ncdhw, w, gamma, beta, mean, var, *, stride=1, pad=1):
    """ConvBnReLU3D forward. x: (B,Cin,D,H,W), w: (Cout,Cin,KD,KH,KW)."""
    B, Cin, D, H, W = x_ncdhw.shape
    Cout, _, KD, KH, KW = w.shape
    Do = (D + 2 * pad - KD) // stride + 1
    Ho = (H + 2 * pad - KH) // stride + 1
    Wo = (W + 2 * pad - KW) // stride + 1
    Dp, Hp, Wp = D + 2 * pad, H + 2 * pad, W + 2 * pad

    # ---- fold BN into the conv weight / bias (tiny trace-time ops) ----
    scale = gamma / jnp.sqrt(var + EPS)                     # (Cout,)
    bias = beta - mean * scale
    w_s = w * scale[:, None, None, None, None]
    core = jnp.transpose(w_s, (2, 3, 4, 1, 0))              # (KD,KH,KW,Cin,Cout)

    # ---- banded weight: fold the kw & Cin contraction into K = Wp*Cin ----
    # W2[kd,kh, wi*Cin+ci, wo*Cout+co] = core[kd,kh, wi - wo*stride, ci, co]
    sel = np.zeros((KW, Wp, Wo), np.float32)
    for kw_ in range(KW):
        for wo_ in range(Wo):
            sel[kw_, wo_ * stride + kw_, wo_] = 1.0
    w_band = jnp.einsum('kwu,abkio->abwiuo', jnp.asarray(sel), core)
    w_band = w_band.reshape(KD * KH, Wp * Cin, Wo * Cout).astype(jnp.bfloat16)

    bias_row = jnp.tile(bias, Wo).reshape(1, Wo * Cout).astype(jnp.float32)

    # ---- pad input, NDHWC, flatten (W,Cin) into the lane dim, cast bf16 ----
    x = jnp.transpose(x_ncdhw, (0, 2, 3, 4, 1))             # (B,D,H,W,Cin)
    x = jnp.pad(x, ((0, 0), (pad, pad), (pad, pad), (pad, pad), (0, 0)))
    x = x.reshape(B, Dp, Hp, Wp * Cin).astype(jnp.bfloat16)

    kern = functools.partial(_conv_bn_lrelu_kernel, KD=KD, KH=KH, Do=Do, Ho=Ho,
                             stride=stride, slope=SLOPE)
    out = pl.pallas_call(
        kern,
        out_shape=jax.ShapeDtypeStruct((B, Do * Ho, Wo * Cout), jnp.float32),
        grid=(B,),
        in_specs=[
            pl.BlockSpec((1, Dp, Hp, Wp * Cin), lambda b: (b, 0, 0, 0)),
            pl.BlockSpec((KD * KH, Wp * Cin, Wo * Cout), lambda b: (0, 0, 0)),
            pl.BlockSpec((1, Wo * Cout), lambda b: (0, 0)),
        ],
        out_specs=pl.BlockSpec((1, Do * Ho, Wo * Cout), lambda b: (b, 0, 0)),
        compiler_params=pltpu.CompilerParams(
            dimension_semantics=("parallel",)),
    )(x, w_band, bias_row)

    out = out.reshape(B, Do, Ho, Wo, Cout)
    return jnp.transpose(out, (0, 4, 1, 2, 3))              # -> NCDHW


# ----------------------------- pure-JAX reference ---------------------------

def _reference(x, w, gamma, beta, mean, var, *, stride, pad):
    y = jax.lax.conv_general_dilated(
        x, w, window_strides=(stride,) * 3, padding=[(pad, pad)] * 3,
        dimension_numbers=("NCDHW", "OIDHW", "NCDHW"))
    scale = (gamma / jnp.sqrt(var + EPS)).reshape(1, -1, 1, 1, 1)
    bias = (beta - mean * gamma / jnp.sqrt(var + EPS)).reshape(1, -1, 1, 1, 1)
    y = y * scale + bias
    return jnp.where(y >= 0, y, SLOPE * y)


# ----------------------------- main ------------------------------------------

if __name__ == "__main__":
    key = jax.random.PRNGKey(0)
    kx, kw, kg, kb, km, kv = jax.random.split(key, 6)

    B, Cin, D, H, W = 2, 4, 8, 16, 16
    Cout, K = 8, 3
    stride, pad = 1, 1

    x = jax.random.normal(kx, (B, Cin, D, H, W), jnp.float32)
    fan_in = Cin * K * K * K
    w = jax.random.normal(kw, (Cout, Cin, K, K, K), jnp.float32) / jnp.sqrt(float(fan_in))
    gamma = 1.0 + 0.1 * jax.random.normal(kg, (Cout,), jnp.float32)
    beta = 0.1 * jax.random.normal(kb, (Cout,), jnp.float32)
    mean = 0.1 * jax.random.normal(km, (Cout,), jnp.float32)
    var = 1.0 + 0.1 * jnp.abs(jax.random.normal(kv, (Cout,), jnp.float32))

    fwd = jax.jit(functools.partial(conv_bn_relu_3d, stride=stride, pad=pad))
    out = jax.block_until_ready(fwd(x, w, gamma, beta, mean, var))

    assert out.shape == (B, Cout, D, H, W), out.shape
    assert bool(jnp.all(jnp.isfinite(out)))

    ref = jax.jit(functools.partial(_reference, stride=stride, pad=pad))(
        x, w, gamma, beta, mean, var)
    err = float(jnp.max(jnp.abs(out - ref)))
    assert err < 5e-2, f"max abs err vs reference: {err}"

    print("KERNEL_OK")
</pallas_src>

<mosaic_0001>
module attributes {stable_mosaic.version = 11 : i64} {
  func.func @_conv_bn_lrelu_kernel(%arg0: i32, %arg1: memref<1x10x18x72xbf16, #tpu.memory_space<vmem>>, %arg2: memref<9x72x128xbf16, #tpu.memory_space<vmem>>, %arg3: memref<1x128xf32, #tpu.memory_space<vmem>>, %arg4: memref<1x128x128xf32, #tpu.memory_space<vmem>>) attributes {dimension_semantics = [#tpu.dimension_semantics<parallel>], iteration_bounds = array<i64: 2>, scalar_prefetch = 0 : i64, scratch_operands = 0 : i64, tpu.core_type = #tpu.core_type<tc>, window_params = [{transform_indices = @transform_0, window_bounds = array<i64: 1, 10, 18, 72>}, {pipeline_mode = #tpu.pipeline_mode<synchronous>, transform_indices = @transform_1, window_bounds = array<i64: 9, 72, 128>}, {pipeline_mode = #tpu.pipeline_mode<synchronous>, transform_indices = @transform_2, window_bounds = array<i64: 1, 128>}, {transform_indices = @transform_3, window_bounds = array<i64: 1, 128, 128>}]} {
    %cst = arith.constant 0.000000e+00 : f32
    %0 = vector.broadcast %cst : f32 to vector<128x128xf32>
    %c0 = arith.constant 0 : index
    %c0_0 = arith.constant 0 : index
    %c0_1 = arith.constant 0 : index
    %c0_2 = arith.constant 0 : index
    %1 = vector.load %arg1[%c0, %c0_0, %c0_1, %c0_2] : memref<1x10x18x72xbf16, #tpu.memory_space<vmem>>, vector<1x8x16x72xbf16>
    %2 = vector.shape_cast %1 : vector<1x8x16x72xbf16> to vector<8x16x72xbf16>
    %3 = vector.shape_cast %2 : vector<8x16x72xbf16> to vector<128x72xbf16>
    %c0_3 = arith.constant 0 : index
    %c0_4 = arith.constant 0 : index
    %c0_5 = arith.constant 0 : index
    %4 = vector.load %arg2[%c0_3, %c0_4, %c0_5] : memref<9x72x128xbf16, #tpu.memory_space<vmem>>, vector<1x72x128xbf16>
    %5 = vector.shape_cast %4 : vector<1x72x128xbf16> to vector<72x128xbf16>
    %cst_6 = arith.constant dense<0.000000e+00> : vector<128x128xf32>
    %6 = tpu.matmul %3, %5, %cst_6 {dimension_numbers = #tpu.dot_dimension_numbers<[1], [0], [0], [1], [0, 0, 1, 1], [], []>} : vector<128x72xbf16>, vector<72x128xbf16>, vector<128x128xf32> -> vector<128x128xf32>
    %7 = arith.addf %0, %6 : vector<128x128xf32>
    %c0_7 = arith.constant 0 : index
    %c0_8 = arith.constant 0 : index
    %c1 = arith.constant 1 : index
    %c0_9 = arith.constant 0 : index
    %8 = vector.load %arg1[%c0_7, %c0_8, %c1, %c0_9] : memref<1x10x18x72xbf16, #tpu.memory_space<vmem>>, vector<1x8x16x72xbf16>
    %9 = vector.shape_cast %8 : vector<1x8x16x72xbf16> to vector<8x16x72xbf16>
    %10 = vector.shape_cast %9 : vector<8x16x72xbf16> to vector<128x72xbf16>
    %c1_10 = arith.constant 1 : index
    %c0_11 = arith.constant 0 : index
    %c0_12 = arith.constant 0 : index
    %11 = vector.load %arg2[%c1_10, %c0_11, %c0_12] : memref<9x72x128xbf16, #tpu.memory_space<vmem>>, vector<1x72x128xbf16>
    %12 = vector.shape_cast %11 : vector<1x72x128xbf16> to vector<72x128xbf16>
    %cst_13 = arith.constant dense<0.000000e+00> : vector<128x128xf32>
    %13 = tpu.matmul %10, %12, %cst_13 {dimension_numbers = #tpu.dot_dimension_numbers<[1], [0], [0], [1], [0, 0, 1, 1], [], []>} : vector<128x72xbf16>, vector<72x128xbf16>, vector<128x128xf32> -> vector<128x128xf32>
    %14 = arith.addf %7, %13 : vector<128x128xf32>
    %c0_14 = arith.constant 0 : index
    %c0_15 = arith.constant 0 : index
    %c2 = arith.constant 2 : index
    %c0_16 = arith.constant 0 : index
    %15 = vector.load %arg1[%c0_14, %c0_15, %c2, %c0_16] : memref<1x10x18x72xbf16, #tpu.memory_space<vmem>>, vector<1x8x16x72xbf16>
    %16 = vector.shape_cast %15 : vector<1x8x16x72xbf16> to vector<8x16x72xbf16>
    %17 = vector.shape_cast %16 : vector<8x16x72xbf16> to vector<128x72xbf16>
    %c2_17 = arith.constant 2 : index
    %c0_18 = arith.constant 0 : index
    %c0_19 = arith.constant 0 : index
    %18 = vector.load %arg2[%c2_17, %c0_18, %c0_19] : memref<9x72x128xbf16, #tpu.memory_space<vmem>>, vector<1x72x128xbf16>
    %19 = vector.shape_cast %18 : vector<1x72x128xbf16> to vector<72x128xbf16>
    %cst_20 = arith.constant dense<0.000000e+00> : vector<128x128xf32>
    %20 = tpu.matmul %17, %19, %cst_20 {dimension_numbers = #tpu.dot_dimension_numbers<[1], [0], [0], [1], [0, 0, 1, 1], [], []>} : vector<128x72xbf16>, vector<72x128xbf16>, vector<128x128xf32> -> vector<128x128xf32>
    %21 = arith.addf %14, %20 : vector<128x128xf32>
    %c0_21 = arith.constant 0 : index
    %c1_22 = arith.constant 1 : index
    %c0_23 = arith.constant 0 : index
    %c0_24 = arith.constant 0 : index
    %22 = vector.load %arg1[%c0_21, %c1_22, %c0_23, %c0_24] : memref<1x10x18x72xbf16, #tpu.memory_space<vmem>>, vector<1x8x16x72xbf16>
    %23 = vector.shape_cast %22 : vector<1x8x16x72xbf16> to vector<8x16x72xbf16>
    %24 = vector.shape_cast %23 : vector<8x16x72xbf16> to vector<128x72xbf16>
    %c3 = arith.constant 3 : index
    %c0_25 = arith.constant 0 : index
    %c0_26 = arith.constant 0 : index
    %25 = vector.load %arg2[%c3, %c0_25, %c0_26] : memref<9x72x128xbf16, #tpu.memory_space<vmem>>, vector<1x72x128xbf16>
    %26 = vector.shape_cast %25 : vector<1x72x128xbf16> to vector<72x128xbf16>
    %cst_27 = arith.constant dense<0.000000e+00> : vector<128x128xf32>
    %27 = tpu.matmul %24, %26, %cst_27 {dimension_numbers = #tpu.dot_dimension_numbers<[1], [0], [0], [1], [0, 0, 1, 1], [], []>} : vector<128x72xbf16>, vector<72x128xbf16>, vector<128x128xf32> -> vector<128x128xf32>
    %28 = arith.addf %21, %27 : vector<128x128xf32>
    %c0_28 = arith.constant 0 : index
    %c1_29 = arith.constant 1 : index
    %c1_30 = arith.constant 1 : index
    %c0_31 = arith.constant 0 : index
    %29 = vector.load %arg1[%c0_28, %c1_29, %c1_30, %c0_31] : memref<1x10x18x72xbf16, #tpu.memory_space<vmem>>, vector<1x8x16x72xbf16>
    %30 = vector.shape_cast %29 : vector<1x8x16x72xbf16> to vector<8x16x72xbf16>
    %31 = vector.shape_cast %30 : vector<8x16x72xbf16> to vector<128x72xbf16>
    %c4 = arith.constant 4 : index
    %c0_32 = arith.constant 0 : index
    %c0_33 = arith.constant 0 : index
    %32 = vector.load %arg2[%c4, %c0_32, %c0_33] : memref<9x72x128xbf16, #tpu.memory_space<vmem>>, vector<1x72x128xbf16>
    %33 = vector.shape_cast %32 : vector<1x72x128xbf16> to vector<72x128xbf16>
    %cst_34 = arith.constant dense<0.000000e+00> : vector<128x128xf32>
    %34 = tpu.matmul %31, %33, %cst_34 {dimension_numbers = #tpu.dot_dimension_numbers<[1], [0], [0], [1], [0, 0, 1, 1], [], []>} : vector<128x72xbf16>, vector<72x128xbf16>, vector<128x128xf32> -> vector<128x128xf32>
    %35 = arith.addf %28, %34 : vector<128x128xf32>
    %c0_35 = arith.constant 0 : index
    %c1_36 = arith.constant 1 : index
    %c2_37 = arith.constant 2 : index
    %c0_38 = arith.constant 0 : index
    %36 = vector.load %arg1[%c0_35, %c1_36, %c2_37, %c0_38] : memref<1x10x18x72xbf16, #tpu.memory_space<vmem>>, vector<1x8x16x72xbf16>
    %37 = vector.shape_cast %36 : vector<1x8x16x72xbf16> to vector<8x16x72xbf16>
    %38 = vector.shape_cast %37 : vector<8x16x72xbf16> to vector<128x72xbf16>
    %c5 = arith.constant 5 : index
    %c0_39 = arith.constant 0 : index
    %c0_40 = arith.constant 0 : index
    %39 = vector.load %arg2[%c5, %c0_39, %c0_40] : memref<9x72x128xbf16, #tpu.memory_space<vmem>>, vector<1x72x128xbf16>
    %40 = vector.shape_cast %39 : vector<1x72x128xbf16> to vector<72x128xbf16>
    %cst_41 = arith.constant dense<0.000000e+00> : vector<128x128xf32>
    %41 = tpu.matmul %38, %40, %cst_41 {dimension_numbers = #tpu.dot_dimension_numbers<[1], [0], [0], [1], [0, 0, 1, 1], [], []>} : vector<128x72xbf16>, vector<72x128xbf16>, vector<128x128xf32> -> vector<128x128xf32>
    %42 = arith.addf %35, %41 : vector<128x128xf32>
    %c0_42 = arith.constant 0 : index
    %c2_43 = arith.constant 2 : index
    %c0_44 = arith.constant 0 : index
    %c0_45 = arith.constant 0 : index
    %43 = vector.load %arg1[%c0_42, %c2_43, %c0_44, %c0_45] : memref<1x10x18x72xbf16, #tpu.memory_space<vmem>>, vector<1x8x16x72xbf16>
    %44 = vector.shape_cast %43 : vector<1x8x16x72xbf16> to vector<8x16x72xbf16>
    %45 = vector.shape_cast %44 : vector<8x16x72xbf16> to vector<128x72xbf16>
    %c6 = arith.constant 6 : index
    %c0_46 = arith.constant 0 : index
    %c0_47 = arith.constant 0 : index
    %46 = vector.load %arg2[%c6, %c0_46, %c0_47] : memref<9x72x128xbf16, #tpu.memory_space<vmem>>, vector<1x72x128xbf16>
    %47 = vector.shape_cast %46 : vector<1x72x128xbf16> to vector<72x128xbf16>
    %cst_48 = arith.constant dense<0.000000e+00> : vector<128x128xf32>
    %48 = tpu.matmul %45, %47, %cst_48 {dimension_numbers = #tpu.dot_dimension_numbers<[1], [0], [0], [1], [0, 0, 1, 1], [], []>} : vector<128x72xbf16>, vector<72x128xbf16>, vector<128x128xf32> -> vector<128x128xf32>
    %49 = arith.addf %42, %48 : vector<128x128xf32>
    %c0_49 = arith.constant 0 : index
    %c2_50 = arith.constant 2 : index
    %c1_51 = arith.constant 1 : index
    %c0_52 = arith.constant 0 : index
    %50 = vector.load %arg1[%c0_49, %c2_50, %c1_51, %c0_52] : memref<1x10x18x72xbf16, #tpu.memory_space<vmem>>, vector<1x8x16x72xbf16>
    %51 = vector.shape_cast %50 : vector<1x8x16x72xbf16> to vector<8x16x72xbf16>
    %52 = vector.shape_cast %51 : vector<8x16x72xbf16> to vector<128x72xbf16>
    %c7 = arith.constant 7 : index
    %c0_53 = arith.constant 0 : index
    %c0_54 = arith.constant 0 : index
    %53 = vector.load %arg2[%c7, %c0_53, %c0_54] : memref<9x72x128xbf16, #tpu.memory_space<vmem>>, vector<1x72x128xbf16>
    %54 = vector.shape_cast %53 : vector<1x72x128xbf16> to vector<72x128xbf16>
    %cst_55 = arith.constant dense<0.000000e+00> : vector<128x128xf32>
    %55 = tpu.matmul %52, %54, %cst_55 {dimension_numbers = #tpu.dot_dimension_numbers<[1], [0], [0], [1], [0, 0, 1, 1], [], []>} : vector<128x72xbf16>, vector<72x128xbf16>, vector<128x128xf32> -> vector<128x128xf32>
    %56 = arith.addf %49, %55 : vector<128x128xf32>
    %c0_56 = arith.constant 0 : index
    %c2_57 = arith.constant 2 : index
    %c2_58 = arith.constant 2 : index
    %c0_59 = arith.constant 0 : index
    %57 = vector.load %arg1[%c0_56, %c2_57, %c2_58, %c0_59] : memref<1x10x18x72xbf16, #tpu.memory_space<vmem>>, vector<1x8x16x72xbf16>
    %58 = vector.shape_cast %57 : vector<1x8x16x72xbf16> to vector<8x16x72xbf16>
    %59 = vector.shape_cast %58 : vector<8x16x72xbf16> to vector<128x72xbf16>
    %c8 = arith.constant 8 : index
    %c0_60 = arith.constant 0 : index
    %c0_61 = arith.constant 0 : index
    %60 = vector.load %arg2[%c8, %c0_60, %c0_61] : memref<9x72x128xbf16, #tpu.memory_space<vmem>>, vector<1x72x128xbf16>
    %61 = vector.shape_cast %60 : vector<1x72x128xbf16> to vector<72x128xbf16>
    %cst_62 = arith.constant dense<0.000000e+00> : vector<128x128xf32>
    %62 = tpu.matmul %59, %61, %cst_62 {dimension_numbers = #tpu.dot_dimension_numbers<[1], [0], [0], [1], [0, 0, 1, 1], [], []>} : vector<128x72xbf16>, vector<72x128xbf16>, vector<128x128xf32> -> vector<128x128xf32>
    %63 = arith.addf %56, %62 : vector<128x128xf32>
    %c0_63 = arith.constant 0 : index
    %c0_64 = arith.constant 0 : index
    %64 = vector.load %arg3[%c0_63, %c0_64] : memref<1x128xf32, #tpu.memory_space<vmem>>, vector<1x128xf32>
    %65 = vector.broadcast %64 : vector<1x128xf32> to vector<128x128xf32>
    %66 = arith.addf %63, %65 : vector<128x128xf32>
    %cst_65 = arith.constant 0.000000e+00 : f32
    %67 = vector.broadcast %cst_65 : f32 to vector<128x128xf32>
    %68 = arith.cmpf oge, %66, %67 : vector<128x128xf32>
    %cst_66 = arith.constant 0.00999999977 : f32
    %69 = vector.broadcast %cst_66 : f32 to vector<128x128xf32>
    %70 = arith.mulf %69, %66 : vector<128x128xf32>
    %71 = arith.select %68, %66, %70 : vector<128x128xi1>, vector<128x128xf32>
    %c0_67 = arith.constant 0 : index
    %c0_68 = arith.constant 0 : index
    %c0_69 = arith.constant 0 : index
    %72 = vector.load %arg4[%c0_67, %c0_68, %c0_69] : memref<1x128x128xf32, #tpu.memory_space<vmem>>, vector<1x128x128xf32>
    %73 = vector.shape_cast %72 : vector<1x128x128xf32> to vector<128x128xf32>
    %74 = vector.shape_cast %71 : vector<128x128xf32> to vector<1x128x128xf32>
    tpu.vector_store %arg4[%c0_67, %c0_68, %c0_69], %74 {strides = array<i32>} : memref<1x128x128xf32, #tpu.memory_space<vmem>>, vector<1x128x128xf32>,
    return
  }
  func.func @transform_0(%arg0: i32) -> (i32, i32, i32, i32) {
    %c0_i32 = arith.constant 0 : i32
    %c0_i32_0 = arith.constant 0 : i32
    %c0_i32_1 = arith.constant 0 : i32
    %c0_i32_2 = arith.constant 0 : i32
    return %arg0, %c0_i32, %c0_i32_0, %c0_i32_1 : i32, i32, i32, i32
  }
  func.func @transform_1(%arg0: i32) -> (i32, i32, i32) {
    %c0_i32 = arith.constant 0 : i32
    %c0_i32_0 = arith.constant 0 : i32
    %c0_i32_1 = arith.constant 0 : i32
    %c0_i32_2 = arith.constant 0 : i32
    return %c0_i32, %c0_i32_0, %c0_i32_1 : i32, i32, i32
  }
  func.func @transform_2(%arg0: i32) -> (i32, i32) {
    %c0_i32 = arith.constant 0 : i32
    %c0_i32_0 = arith.constant 0 : i32
    %c0_i32_1 = arith.constant 0 : i32
    return %c0_i32, %c0_i32_0 : i32, i32
  }
  func.func @transform_3(%arg0: i32) -> (i32, i32, i32) {
    %c0_i32 = arith.constant 0 : i32
    %c0_i32_0 = arith.constant 0 : i32
    %c0_i32_1 = arith.constant 0 : i32
    return %arg0, %c0_i32, %c0_i32_0 : i32, i32, i32
  }
}

</mosaic_0001>

<bundles_post_ra>
// kernel: tile.8
= control target key start
LH: loop header
LB: loop body
LE: loop exit
PB: predicated region body
PF: predicated region fallthrough
CT: control target
= control target key end

     0   :  { %s28_s0 = inlined_call_operand.vmem [shape: f32[8], index: 0, kind: input, shape index: {}]   ;;  %s29_s1 = inlined_call_operand.vmem [shape: f32[16,8], index: 1, kind: output, shape index: {}]  }
   0x1   :  { %v4_v0 = vld [vmem:[%s28_s0] ss:$0 sm:$0xff] }
   0x2   :  { %5 = vst [vmem:[%s29_s1] sm:$0xff] %v4_v0  ;;  %8 = vst [vmem:[%s29_s1 + $0x8] sm:$0xff] %v4_v0 }

// kernel: tile.9
= control target key start
LH: loop header
LB: loop body
LE: loop exit
PB: predicated region body
PF: predicated region fallthrough
CT: control target
= control target key end

     0   :  { %s131_s10 = smov 120   ;;  %s132_s11 = smov 104   ;;  %vm3_vm0 = vcmask 64512   ;;  %vm9_vm1 = vcmask 1048512   ;;  %vm15_vm2 = vcmask 982912   ;;  %vm21_vm3 = vcmask 917312   ;;  %s207_s0 = inlined_call_operand.vmem [shape: f32[16,8], index: 0, kind: input, shape index: {}]   ;;  %s208_s1 = inlined_call_operand.vmem [shape: f32[1,128], index: 1, kind: output, shape index: {}]  }
   0x1   :  { %v101_v0 = vld [vmem:[%s207_s0 + $0xf] sm:$0x1]   ;;  %v103_v1 = vld [vmem:[%s207_s0 + $0xd] sm:$0x1]   ;;  %v102_v2 = vld [vmem:[%s207_s0 + $0xe] sm:$0x1]  }
   0x2   :  { %7 = vrot.lane.b32.xlu0 %v101_v0, %s131_s10  ;;  %19 = vrot.lane.b32.xlu1 %v103_v1, %s132_s11  ;;  %v104_v3 = vld [vmem:[%s207_s0 + $0xc] sm:$0x1]   ;;  %s133_s16 = smov 112   ;;  %s134_s17 = smov 96   ;;  %v105_v4 = vld [vmem:[%s207_s0 + $0xb] sm:$0x1]  }
   0x3   :  { %v106_v5 = vld [vmem:[%s207_s0 + $0xa] sm:$0x1]   ;;  %v2_v6 = vld [vmem:[%s207_s0] sm:$0x1]   ;;  %s135_s24 = smov 88   ;;  %s136_s25 = smov 80  }
   0x4   :  { %4 = vst.msk [vmem:[#allocation0] sm:$0x1] %vm3_vm0, %v2_v6   ;;  %v107_v7 = vld [vmem:[%s207_s0 + $0x9] sm:$0x1]   ;;  %v108_v8 = vld [vmem:[%s207_s0 + $0x8] sm:$0x1]  }
   0x5   :  { %s137_s30 = smov 72   ;;  %s138_s2 = smov 64   ;;  %v109_v9 = vld [vmem:[%s207_s0 + $0x7] sm:$0x1]   ;;  %v110_v10 = vld [vmem:[%s207_s0 + $0x6] sm:$0x1]  }
   0x6   :  { %13 = vrot.lane.b32.xlu0 %v102_v2, %s133_s16  ;;  %25 = vrot.lane.b32.xlu1 %v104_v3, %s134_s17  ;;  %s139_s7 = smov 56   ;;  %s140_s8 = smov 48   ;;  %v111_v11 = vld [vmem:[%s207_s0 + $0x5] sm:$0x1]   ;;  %v112_v12 = vld [vmem:[%s207_s0 + $0x4] sm:$0x1]  }
   0x7   :  { %s141_s13 = smov 40   ;;  %s142_s14 = smov 32   ;;  %v113_v13 = vld [vmem:[%s207_s0 + $0x3] sm:$0x1]   ;;  %v114_v14 = vld [vmem:[%s207_s0 + $0x2] sm:$0x1]  }
   0x8   :  { %s143_s19 = smov 24   ;;  %s144_s20 = smov 16   ;;  %v115_v15 = vld [vmem:[%s207_s0 + $0x1] sm:$0x1]   ;;  %vm27_vm4 = vcmask 851712   ;;  %vm33_vm5 = vcmask 786112  }
   0x9   :  { %s145_s0 = smov 8   ;;  %vm39_vm6 = vcmask 720512   ;;  %vm45_vm7 = vcmask 654912   ;;  %vm51_vm8 = vcmask 589312   ;;  %vm57_vm9 = vcmask 523712  }
   0xa   :  { %31 = vrot.lane.b32.xlu0 %v105_v4, %s135_s24  ;;  %37 = vrot.lane.b32.xlu1 %v106_v5, %s136_s25  ;;  %vm63_vm10 = vcmask 458112   ;;  %vm69_vm11 = vcmask 392512   ;;  %vm75_vm12 = vcmask 326912   ;;  %vm81_vm13 = vcmask 261312  }
   0xb   :  { %vm87_vm14 = vcmask 195712   ;;  %vm93_vm15 = vcmask 130112  }
   0xe   :  { %43 = vrot.lane.b32.xlu0 %v107_v7, %s137_s30  ;;  %49 = vrot.lane.b32.xlu1 %v108_v8, %s138_s2 }
  0x12   :  { %55 = vrot.lane.b32.xlu0 %v109_v9, %s139_s7  ;;  %61 = vrot.lane.b32.xlu1 %v110_v10, %s140_s8 }
  0x16   :  { %67 = vrot.lane.b32.xlu0 %v111_v11, %s141_s13  ;;  %73 = vrot.lane.b32.xlu1 %v112_v12, %s142_s14 }
  0x1a   :  { %79 = vrot.lane.b32.xlu0 %v113_v13, %s143_s19  ;;  %85 = vrot.lane.b32.xlu1 %v114_v14, %s144_s20 }
  0x1e   :  { %91 = vrot.lane.b32.xlu0 %v115_v15, %s145_s0 }
  0x74   :  { %v8_v16 = vpop.permute.xlu0 %7   ;;  %v20_v17 = vpop.permute.xlu1 %19  }
  0x75   :  { %10 = vst.msk [vmem:[#allocation0] sm:$0x1] %vm9_vm1, %v8_v16  }
  0x78   :  { %v14_v18 = vpop.permute.xlu0 %13   ;;  %v26_v19 = vpop.permute.xlu1 %25  }
  0x79   :  { %16 = vst.msk [vmem:[#allocation0] sm:$0x1] %vm15_vm2, %v14_v18  }
  0x7a   :  { %22 = vst.msk [vmem:[#allocation0] sm:$0x1] %vm21_vm3, %v20_v17  }
  0x7b   :  { %28 = vst.msk [vmem:[#allocation0] sm:$0x1] %vm27_vm4, %v26_v19  }
  0x7c   :  { %v32_v20 = vpop.permute.xlu0 %31   ;;  %v38_v21 = vpop.permute.xlu1 %37  }
  0x7d   :  { %34 = vst.msk [vmem:[#allocation0] sm:$0x1] %vm33_vm5, %v32_v20  }
  0x7e   :  { %40 = vst.msk [vmem:[#allocation0] sm:$0x1] %vm39_vm6, %v38_v21  }
  0x80   :  { %v44_v22 = vpop.permute.xlu0 %43   ;;  %v50_v23 = vpop.permute.xlu1 %49  }
  0x81   :  { %46 = vst.msk [vmem:[#allocation0] sm:$0x1] %vm45_vm7, %v44_v22  }
  0x82   :  { %52 = vst.msk [vmem:[#allocation0] sm:$0x1] %vm51_vm8, %v50_v23  }
  0x84   :  { %v56_v24 = vpop.permute.xlu0 %55   ;;  %v62_v25 = vpop.permute.xlu1 %61  }
  0x85   :  { %58 = vst.msk [vmem:[#allocation0] sm:$0x1] %vm57_vm9, %v56_v24  }
  0x86   :  { %64 = vst.msk [vmem:[#allocation0] sm:$0x1] %vm63_vm10, %v62_v25  }
  0x88   :  { %v68_v26 = vpop.permute.xlu0 %67   ;;  %v74_v27 = vpop.permute.xlu1 %73  }
  0x89   :  { %70 = vst.msk [vmem:[#allocation0] sm:$0x1] %vm69_vm11, %v68_v26  }
  0x8a   :  { %76 = vst.msk [vmem:[#allocation0] sm:$0x1] %vm75_vm12, %v74_v27  }
  0x8c   :  { %v80_v28 = vpop.permute.xlu0 %79   ;;  %v86_v29 = vpop.permute.xlu1 %85  }
  0x8d   :  { %82 = vst.msk [vmem:[#allocation0] sm:$0x1] %vm81_vm13, %v80_v28  }
  0x8e   :  { %88 = vst.msk [vmem:[#allocation0] sm:$0x1] %vm87_vm14, %v86_v29  }
  0x90   :  { %v92_v30 = vpop.permute.xlu0 %91  }
  0x91   :  { %94 = vst.msk [vmem:[#allocation0] sm:$0x1] %vm93_vm15, %v92_v30  }
  0x98   :  { %v98_v31 = vld [vmem:[#allocation0] sm:$0x1] }
  0x99   :  { %100 = vst [vmem:[%s208_s1] sm:$0x1] %v98_v31 }

// kernel: conv_bn_relu_3d.1
= control target key start
LH: loop header
LB: loop body
LE: loop exit
PB: predicated region body
PF: predicated region fallthrough
CT: control target
= control target key end

     0   :  { %s4085_s12 = smov 0   ;;  %s5176_s0 = inlined_call_operand.vmem [shape: bf16[2,10,18,72], index: 0, kind: input, shape index: {}]   ;;  %s5177_s1 = inlined_call_operand.vmem [shape: bf16[9,72,128], index: 1, kind: input, shape index: {}]   ;;  %s5178_s2 = inlined_call_operand.vmem [shape: f32[1,128], index: 2, kind: input, shape index: {}]   ;;  %s5179_s3 = inlined_call_operand.vmem [shape: f32[2,128,128], index: 3, kind: output, shape index: {}]  }
   0x1 LB: > { %s3084_s13 = sadd.s32 4294967295, %s4063_s12   ;;  %p3088_p0 = scmp.ge.s32.totalorder %s4063_s12, 1  ;;  %s4063_s12 = sphi %s4085_s12, %s13_s12  }
   0x2   : > { %p137_p1 = scmp.lt.s32.totalorder %s4063_s12, 3 }
   0x4   : > { %p138_p2 = pnand %p3088_p0, %p137_p1 }
   0x6   : > { %141 = sbr.rel (%p138_p2) target bundleno = 433 (0x1b1), region = 32 }
   0xd   : > { %v3985_v0 = vld [vmem:[%s5177_s1 + $0x24] sm:$0xff]   ;;  %v3986_v1 = vld [vmem:[%s5177_s1 + $0x90] sm:$0xff]   ;;  %p161_p3 = scmp.lt.s32.totalorder %s3084_s13, 1  ;;  %v3988_v3 = vld [vmem:[%s5177_s1 + $0x98] sm:$0xff]   ;;  %vm486_vm0 = vcmask 1043456   ;;  %vm461_vm3 = vcmask 588800  }
   0xe   : > { %3594 = vmatprep.subr.bf16.mxu1 %v3985_v0  ;;  %v3987_v2 = vld [vmem:[%s5177_s1 + $0x2c] sm:$0xff]   ;;  %3698 = vmatprep.subr.bf16.mxu0 %v3986_v1  ;;  %v3989_v4 = vld [vmem:[%s5177_s1 + $0x34] sm:$0xff]   ;;  %v3990_v5 = vld [vmem:[%s5177_s1 + $0xa0] sm:$0xff]   ;;  %vm205_vm1 = vsmask.f32 3328  ;;  %vm802_vm5 = vcmask 1042432  }
   0xf   : > { %3595 = vmatpush3.bf16.msra.mxu1 %v3985_v0  ;;  %s5197_s13 = smov (!%p161_p3, %s3084_s13), 1  ;;  %3699 = vmatpush3.bf16.msra.mxu0 %v3986_v1  ;;  %v3991_v6 = vld [vmem:[%s5177_s1 + $0x3c] sm:$0xff]   ;;  %v3993_v7 = vld [vmem:[%s5177_s1 + $0x44] ss:$0 sps:$4 sm:$0xff]   ;;  %v3992_v8 = vld [vmem:[%s5177_s1 + $0xa8] sm:$0xff]   ;;  %vm803_vm6 = vcmask 1046532  }
  0x10   : > { %3596 = vmatprep.subr.bf16.mxu1 %v3987_v2  ;;  %3700 = vmatprep.subr.bf16.mxu0 %v3988_v3  ;;  %s3976_s26 = smul.u32 120, %s5197_s13  ;;  %v3994_v11 = vld [vmem:[%s5177_s1 + $0xb0] ss:$0 sps:$4 sm:$0xff]   ;;  %vm206_vm2 = vsmask.f32 7440  ;;  %v488_v16 = vsel %vm486_vm0, %v3993_v7, 0  ;;  %vm4470_vm7 = vmor %vm802_vm5, %vm803_vm6 }
  0x11   : > { %v1598_v25 = vsel %vm486_vm0, %v3994_v11, 0  ;;  %vm4163_vm4 = vmor %vm205_vm1, %vm206_vm2  ;;  %v4173_v40 = vld [vmem:[%s5177_s1] sm:$0xff]   ;;  %v4179_v44 = vld [vmem:[%s5177_s1 + $0xb4] sm:$0xff]   ;;  %s3476_s10 = sshll.u32 %s5197_s13, 7 }
  0x12   : > { %s4120_s4 = scalar_lea.vmem %s5176_s0, %s3976_s26  ;;  %s5132_s15 = scalar_lea.vmem %s5179_s3, %s3476_s10 }
  0x13   : > { %3597 = vmatpush3.bf16.msra.mxu1 %v3987_v2  ;;  %3701 = vmatpush3.bf16.msra.mxu0 %v3988_v3  ;;  %v4129_v9 = vld [vmem:[%s4120_s4] sm:$0xf]  ;;  %v4132_v10 = vld [vmem:[%s4120_s4 + $0x4] sm:$0xf]  ;;  %v4138_v12 = vld [vmem:[%s4120_s4 + $0x8] sm:$0x1] }
  0x14   : > { %3598 = vmatprep.subr.bf16.mxu1 %v3989_v4  ;;  %3702 = vmatprep.subr.bf16.mxu0 %v3990_v5  ;;  %v209_v13 = vshrl.u32 %v4129_v9, 16  ;;  %v212_v14 = vshll.u32 %v4129_v9, 16  ;;  %v218_v15 = vshll.u32 %v4132_v10, 16  ;;  %v222_v18 = vshrl.u32 %v4132_v10, 16  ;;  %v3227_v20 = vld [vmem:[%s4120_s4 + $0xc] sm:$0xf] }
  0x15   : > { %v228_v19 = vshll.u32 %v4138_v12, 16  ;;  %v4148_v23 = vld [vmem:[%s4120_s4 + $0x10] sm:$0xf]  ;;  %v4151_v24 = vld [vmem:[%s4120_s4 + $0x14] sm:$0x1]  ;;  %v1321_v27 = vshrl.u32 %v3227_v20, 16 }
  0x16   : > { %v211_v17 = vrot.slane %v209_v13, 4  ;;  %v214_v21 = vrot.slane %v212_v14, 5  ;;  %v220_v22 = vrot.slane %v218_v15, 5  ;;  %v224_v26 = vrot.slane %v222_v18, 4  ;;  %v4158_v33 = vld [vmem:[%s4120_s4 + $0xc] sm:$0xf] }
  0x17   : > { %3599 = vmatpush3.bf16.msra.mxu1 %v3989_v4  ;;  %3703 = vmatpush3.bf16.msra.mxu0 %v3990_v5  ;;  %v1324_v28 = vshll.u32 %v3227_v20, 16  ;;  %v1330_v30 = vshll.u32 %v4148_v23, 16  ;;  %v1334_v31 = vshrl.u32 %v4148_v23, 16  ;;  %v1340_v32 = vshll.u32 %v4151_v24, 16  ;;  %v4168_v39 = vld [vmem:[%s4120_s4 + $0x10] sm:$0xf] }
  0x18   : > { %3600 = vmatprep.subr.bf16.mxu1 %v3991_v6  ;;  %3704 = vmatprep.subr.bf16.mxu0 %v3992_v8  ;;  %v215_v29 = vor.u32 %v214_v21, %v211_v17  ;;  %v225_v35 = vor.u32 %v224_v26, %v220_v22  ;;  %v230_v36 = vrot.slane %v228_v19, 5  ;;  %v1323_v37 = vrot.slane %v1321_v27, 4  ;;  %v4185_v51 = vld [vmem:[%s4120_s4 + $0x14] sm:$0x1]  ;;  %v3230_v58 = vld [vmem:[%s4120_s4 + $0x18] sm:$0xf] }
  0x19   : > { %v1326_v38 = vrot.slane %v1324_v28, 5  ;;  %v1332_v42 = vrot.slane %v1330_v30, 5  ;;  %v1336_v43 = vrot.slane %v1334_v31, 4  ;;  %v1342_v47 = vrot.slane %v1340_v32, 5  ;;  %v4199_v2 = vld [vmem:[%s4120_s4 + $0x1c] sm:$0xf] }
  0x1a   : > { %v216_v41 = vrot.slane %v215_v29, 4  ;;  %v226_v45 = vrot.slane %v225_v35, 4  ;;  %v233_v48 = vshrl.u32 %v4158_v33, 16  ;;  %v236_v52 = vshll.u32 %v4158_v33, 16  ;;  %v4219_v29 = vld [vmem:[%s4120_s4 + $0x1c] sm:$0xf] }
  0x1b   : > { %3601 = vmatpush3.bf16.msra.mxu1 %v3991_v6  ;;  %3705 = vmatpush3.bf16.msra.mxu0 %v3992_v8  ;;  %v1327_v46 = vor.u32 %v1326_v38, %v1323_v37  ;;  %v1337_v50 = vor.u32 %v1336_v43, %v1332_v42  ;;  %v242_v53 = vshll.u32 %v4168_v39, 16  ;;  %v246_v57 = vshrl.u32 %v4168_v39, 16  ;;  %v4206_v6 = vld [vmem:[%s4120_s4 + $0x20] sm:$0x1]  ;;  %v3233_v38 = vld [vmem:[%s4120_s4 + $0x24] sm:$0xf] }
  0x1c   : > { %3966 = vmatprep.subr.msk.bf16.mxu1 %vm486_vm0, %v3993_v7  ;;  %3970 = vmatprep.subr.msk.bf16.mxu0 %vm486_vm0, %v3994_v11  ;;  %v221_v49 = vsel %vm4163_vm4, %v216_v41, %v220_v22  ;;  %v231_v54 = vsel %vm4163_vm4, %v226_v45, %v230_v36  ;;  %v235_v56 = vrot.slane %v233_v48, 4  ;;  %v238_v61 = vrot.slane %v236_v52, 5  ;;  %v199_v30 = vld [vmem:[%s4120_s4 + $0x20] sm:$0x1]  ;;  %v4236_v52 = vld [vmem:[%s4120_s4 + $0x28] sm:$0xf] }
  0x1d   : > { %v1328_v55 = vrot.slane %v1327_v46, 4  ;;  %v3101_v59 = vcombine.low %v221_v49, %v231_v54  ;;  %v1338_v60 = vrot.slane %v1337_v50, 4  ;;  %v244_v62 = vrot.slane %v242_v53, 5  ;;  %v3997_v46 = vld [vmem:[%s5177_s1 + $0x8] sm:$0xff]   ;;  %v4411_v31 = vld [vmem:[%s4120_s4 + $0x54] sm:$0xf] }
  0x1e   : > { %v248_v0 = vrot.slane %v246_v57, 4  ;;  %v252_v1 = vshll.u32 %v4185_v51, 16  ;;  %v239_v5 = vor.u32 %v238_v61, %v235_v56  ;;  %v1345_v7 = vshrl.u32 %v3230_v58, 16  ;;  %v4240_v56 = vld [vmem:[%s4120_s4 + $0x2c] sm:$0x1]  ;;  %5184 = vst [vmem:[#allocation2_spill] sm:$0xff] %v4411_v31 }
  0x1f   : > { %3603 = vmatpush3.bf16.msra.mxu1 %v488_v16  ;;  %3707 = vmatpush3.bf16.msra.mxu0 %v1598_v25  ;;  %v1333_v63 = vsel %vm4163_vm4, %v1328_v55, %v1332_v42  ;;  %v1343_v3 = vsel %vm4163_vm4, %v1338_v60, %v1342_v47  ;;  %v1348_v14 = vshll.u32 %v3230_v58, 16  ;;  %v1354_v17 = vshll.u32 %v4199_v2, 16  ;;  %v4214_v25 = vld [vmem:[%s4120_s4 + $0x18] sm:$0xf]  ;;  %v4442_v4 = vld [vmem:[%s4120_s4 + $0x68] sm:$0x1] }
  0x20   : > { %3620 = vmatprep.subr.bf16.mxu1 %v4173_v40  ;;  %3724 = vmatprep.subr.bf16.mxu0 %v4179_v44  ;;  %v3260_v8 = vcombine.low %v1333_v63, %v1343_v3  ;;  %v249_v11 = vor.u32 %v248_v0, %v244_v62  ;;  %v254_v13 = vrot.slane %v252_v1, 5  ;;  %v240_v15 = vrot.slane %v239_v5, 4  ;;  %v3998_v5 = vld [vmem:[%s5177_s1 + $0xbc] sm:$0xff]  }
  0x21   : > { %3604 = vmatprep.mubr.msk.bf16.mxu1 %vm461_vm3, %v3101_v59  ;;  %v1347_v16 = vrot.slane %v1345_v7, 4  ;;  %v1358_v18 = vshrl.u32 %v4199_v2, 16  ;;  %v1350_v21 = vrot.slane %v1348_v14, 5  ;;  %v1364_v22 = vshll.u32 %v4206_v6, 16  ;;  %v4254_v7 = vld [vmem:[%s4120_s4 + $0x28] sm:$0xf] }
  0x22   : > { %3708 = vmatprep.mubr.msk.bf16.mxu0 %vm461_vm3, %v3260_v8  ;;  %v250_v20 = vrot.slane %v249_v11, 4  ;;  %v245_v26 = vsel %vm4163_vm4, %v240_v15, %v244_v62  ;;  %v1356_v27 = vrot.slane %v1354_v17, 5  ;;  %v257_v43 = vshrl.u32 %v4214_v25, 16  ;;  %v4246_v62 = vld [vmem:[%s4120_s4 + $0x24] sm:$0xf] }
  0x23   : > { %v1360_v28 = vrot.slane %v1358_v18, 4  ;;  %v1351_v35 = vor.u32 %v1350_v21, %v1347_v16  ;;  %v1366_v36 = vrot.slane %v1364_v22, 5  ;;  %v260_v45 = vshll.u32 %v4214_v25, 16  ;;  %v4262_v15 = vld [vmem:[%s4120_s4 + $0x2c] sm:$0x1] }
  0x24   : > { %v255_v32 = vsel %vm4163_vm4, %v250_v20, %v254_v13  ;;  %v266_v48 = vshll.u32 %v4219_v29, 16  ;;  %v270_v49 = vshrl.u32 %v4219_v29, 16  ;;  %v276_v50 = vshll.u32 %v199_v30, 16 }
  0x25   : > { %v3102_v41 = vcombine.low %v245_v26, %v255_v32  ;;  %v1361_v42 = vor.u32 %v1360_v28, %v1356_v27  ;;  %v1352_v47 = vrot.slane %v1351_v35, 4  ;;  %v259_v54 = vrot.slane %v257_v43, 4 }
  0x26   : > { %v262_v55 = vrot.slane %v260_v45, 5  ;;  %v1369_v57 = vshrl.u32 %v3233_v38, 16  ;;  %v268_v59 = vrot.slane %v266_v48, 5  ;;  %v272_v60 = vrot.slane %v270_v49, 4  ;;  %v4001_v45 = vld [vmem:[%s5177_s1 + $0x18] sm:$0xff]  }
  0x27   : > { %3605 = vmatmul.mubr.msk.bf16.vlgmr.msra.gmra.mrb[0].mxu1 %vm461_vm3, %v3102_v41  ;;  %v1362_v53 = vrot.slane %v1361_v42, 4  ;;  %v1357_v58 = vsel %vm4163_vm4, %v1352_v47, %v1356_v27  ;;  %v278_v61 = vrot.slane %v276_v50, 5  ;;  %v1372_v3 = vshll.u32 %v3233_v38, 16  ;;  %v4284_v50 = vld [vmem:[%s4120_s4 + $0x34] sm:$0xf] }
  0x28   : > { %3621 = vmatpush3.bf16.msra.mxu1 %v4173_v40  ;;  %v263_v0 = vor.u32 %v262_v55, %v259_v54  ;;  %v1371_v1 = vrot.slane %v1369_v57, 4  ;;  %v3999_v40 = vld [vmem:[%s5177_s1 + $0x10] sm:$0xff]   ;;  %v273_v11 = vor.u32 %v272_v60, %v268_v59  ;;  %v1378_v13 = vshll.u32 %v4236_v52, 16  ;;  %v4287_v57 = vld [vmem:[%s4120_s4 + $0x38] sm:$0x1] }
  0x29   : > { %v1367_v63 = vsel %vm4163_vm4, %v1362_v53, %v1366_v36  ;;  %3622 = vmatprep.subr.bf16.mxu1 %v3997_v46  ;;  %v1382_v14 = vshrl.u32 %v4236_v52, 16  ;;  %v1374_v17 = vrot.slane %v1372_v3, 5  ;;  %v1388_v18 = vshll.u32 %v4240_v56, 16  ;;  %v3236_v36 = vld [vmem:[%s4120_s4 + $0x30] sm:$0xf] }
  0x2a   : > { %v3261_v8 = vcombine.low %v1357_v58, %v1367_v63  ;;  %v264_v16 = vrot.slane %v263_v0, 4  ;;  %v281_v20 = vshrl.u32 %v4246_v62, 16  ;;  %v274_v21 = vrot.slane %v273_v11, 4  ;;  %v4293_v0 = vld [vmem:[%s4120_s4 + $0x30] sm:$0xf] }
  0x2b   : > { %v1380_v22 = vrot.slane %v1378_v13, 5  ;;  %v1384_v26 = vrot.slane %v1382_v14, 4  ;;  %v284_v27 = vshll.u32 %v4246_v62, 16  ;;  %v1375_v30 = vor.u32 %v1374_v17, %v1371_v1  ;;  %v4002_v11 = vld [vmem:[%s5177_s1 + $0xcc] sm:$0xff]   ;;  %v4303_v17 = vld [vmem:[%s4120_s4 + $0x34] sm:$0xf] }
  0x2c   : > { %3709 = vmatmul.mubr.msk.bf16.vlgmr.msra.gmra.mrb[0].mxu0 %vm461_vm3, %v3261_v8  ;;  %3623 = vmatpush3.bf16.msra.mxu1 %v3997_v46  ;;  %v269_v28 = vsel %vm4163_vm4, %v264_v16, %v268_v59  ;;  %v1390_v32 = vrot.slane %v1388_v18, 5  ;;  %v283_v35 = vrot.slane %v281_v20, 4  ;;  %v279_v38 = vsel %vm4163_vm4, %v274_v21, %v278_v61  ;;  %v4306_v18 = vld [vmem:[%s4120_s4 + $0x38] sm:$0x1] }
  0x2d   : > { %3725 = vmatpush3.bf16.msra.mxu0 %v4179_v44  ;;  %3624 = vmatprep.subr.bf16.mxu1 %v3999_v40  ;;  %v1385_v41 = vor.u32 %v1384_v26, %v1380_v22  ;;  %v286_v42 = vrot.slane %v284_v27, 5  ;;  %v290_v43 = vshll.u32 %v4254_v7, 16  ;;  %v4000_v44 = vld [vmem:[%s5177_s1 + $0xc4] sm:$0xff]   ;;  %v3103_v46 = vcombine.low %v269_v28, %v279_v38  ;;  %v3239_v27 = vld [vmem:[%s4120_s4 + $0x3c] sm:$0xf] }
  0x2e   : > { %3726 = vmatprep.subr.bf16.mxu0 %v3998_v5  ;;  %v1376_v47 = vrot.slane %v1375_v30, 4  ;;  %v294_v48 = vshrl.u32 %v4254_v7, 16  ;;  %v300_v49 = vshll.u32 %v4262_v15, 16  ;;  %v1393_v58 = vshrl.u32 %v3236_v36, 16 }
  0x2f   : > { %v1386_v53 = vrot.slane %v1385_v41, 4  ;;  %v287_v54 = vor.u32 %v286_v42, %v283_v35  ;;  %v292_v55 = vrot.slane %v290_v43, 5  ;;  %3608 = vmatprep.mubr.msk.bf16.mxu1 %vm461_vm3, %v3103_v46  ;;  %v1396_v63 = vshll.u32 %v3236_v36, 16  ;;  %v4316_v36 = vld [vmem:[%s4120_s4 + $0x40] sm:$0xf] }
  0x30   : > { %3625 = vmatpush3.bf16.msra.mxu1 %v3999_v40  ;;  %v1381_v59 = vsel %vm4163_vm4, %v1376_v47, %v1380_v22  ;;  %v296_v60 = vrot.slane %v294_v48, 4  ;;  %v302_v61 = vrot.slane %v300_v49, 5  ;;  %v1395_v8 = vrot.slane %v1393_v58, 4 }
  0x31   : > { %3727 = vmatpush3.bf16.msra.mxu0 %v3998_v5  ;;  %v1391_v1 = vsel %vm4163_vm4, %v1386_v53, %v1390_v32  ;;  %v288_v3 = vrot.slane %v287_v54, 4  ;;  %v1402_v40 = vshll.u32 %v4284_v50, 16  ;;  %3626 = vmatprep.subr.bf16.mxu1 %v4001_v45  ;;  %v1398_v16 = vrot.slane %v1396_v63, 5 }
  0x32   : > { %3728 = vmatprep.subr.bf16.mxu0 %v4000_v44  ;;  %v3262_v13 = vcombine.low %v1381_v59, %v1391_v1  ;;  %v297_v14 = vor.u32 %v296_v60, %v292_v55  ;;  %v1406_v5 = vshrl.u32 %v4284_v50, 16  ;;  %v1412_v22 = vshll.u32 %v4287_v57, 16  ;;  %v4326_v60 = vld [vmem:[%s4120_s4 + $0x44] sm:$0x1] }
  0x33   : > { %v293_v20 = vsel %vm4163_vm4, %v288_v3, %v292_v55  ;;  %v1404_v21 = vrot.slane %v1402_v40, 5  ;;  %v305_v26 = vshrl.u32 %v4293_v0, 16  ;;  %v1399_v30 = vor.u32 %v1398_v16, %v1395_v8  ;;  %v4331_v40 = vld [vmem:[%s4120_s4 + $0x3c] sm:$0xf] }
  0x34   : > { %3627 = vmatpush3.bf16.msra.mxu1 %v4001_v45  ;;  %3712 = vmatprep.mubr.msk.bf16.mxu0 %vm461_vm3, %v3262_v13  ;;  %v298_v28 = vrot.slane %v297_v14, 4  ;;  %v1408_v32 = vrot.slane %v1406_v5, 4  ;;  %v308_v35 = vshll.u32 %v4293_v0, 16  ;;  %v1414_v38 = vrot.slane %v1412_v22, 5 }
  0x35   : > { %3729 = vmatpush3.bf16.msra.mxu0 %v4000_v44  ;;  %v307_v41 = vrot.slane %v305_v26, 4  ;;  %v314_v42 = vshll.u32 %v4303_v17, 16  ;;  %v318_v43 = vshrl.u32 %v4303_v17, 16  ;;  %v1400_v46 = vrot.slane %v1399_v30, 4 }
  0x36   : > { %3730 = vmatprep.subr.bf16.mxu0 %v4002_v11  ;;  %v303_v45 = vsel %vm4163_vm4, %v298_v28, %v302_v61  ;;  %v1409_v47 = vor.u32 %v1408_v32, %v1404_v21  ;;  %v310_v48 = vrot.slane %v308_v35, 5  ;;  %v324_v54 = vshll.u32 %v4306_v18, 16 }
  0x37   : > { %v3104_v44 = vcombine.low %v293_v20, %v303_v45  ;;  %v316_v49 = vrot.slane %v314_v42, 5  ;;  %v320_v53 = vrot.slane %v318_v43, 4  ;;  %v1405_v55 = vsel %vm4163_vm4, %v1400_v46, %v1404_v21  ;;  %v4337_v20 = vld [vmem:[%s4120_s4 + $0x40] sm:$0xf]  ;;  %v3242_v45 = vld [vmem:[%s4120_s4 + $0x48] sm:$0xf] }
  0x38   : > { %v1410_v58 = vrot.slane %v1409_v47, 4  ;;  %v311_v59 = vor.u32 %v310_v48, %v307_v41  ;;  %v1417_v63 = vshrl.u32 %v3239_v27, 16  ;;  %v326_v1 = vrot.slane %v324_v54, 5  ;;  %v4347_v41 = vld [vmem:[%s4120_s4 + $0x44] sm:$0x1] }
  0x39   : > { %3731 = vmatpush3.bf16.msra.mxu0 %v4002_v11  ;;  %3609 = vmatmul.mubr.msk.bf16.gmra.mrb[4].mxu1 %vm461_vm3, %v3104_v44  ;;  %v321_v61 = vor.u32 %v320_v53, %v316_v49  ;;  %v1420_v3 = vshll.u32 %v3239_v27, 16  ;;  %v1426_v8 = vshll.u32 %v4316_v36, 16  ;;  %v1430_v5 = vshrl.u32 %v4316_v36, 16 }
  0x3a   : > { %v1415_v13 = vsel %vm4163_vm4, %v1410_v58, %v1414_v38  ;;  %v312_v14 = vrot.slane %v311_v59, 4  ;;  %v1419_v16 = vrot.slane %v1417_v63, 4  ;;  %v1436_v30 = vshll.u32 %v4326_v60, 16  ;;  %v4357_v59 = vld [vmem:[%s4120_s4 + $0x50] sm:$0x1] }
  0x3b   : > { %v3263_v11 = vcombine.low %v1405_v55, %v1415_v13  ;;  %v322_v21 = vrot.slane %v321_v61, 4  ;;  %v1422_v22 = vrot.slane %v1420_v3, 5  ;;  %v1428_v26 = vrot.slane %v1426_v8, 5  ;;  %v4360_v63 = vld [vmem:[%s4120_s4 + $0x48] sm:$0xf] }
  0x3c   : > { %v317_v27 = vsel %vm4163_vm4, %v312_v14, %v316_v49  ;;  %v1432_v28 = vrot.slane %v1430_v5, 4  ;;  %v329_v32 = vshrl.u32 %v4331_v40, 16  ;;  %v332_v42 = vshll.u32 %v4331_v40, 16  ;;  %v4353_v49 = vld [vmem:[%s4120_s4 + $0x4c] sm:$0xf] }
  0x3d   : > { %3713 = vmatmul.mubr.msk.bf16.gmra.mrb[4].mxu0 %vm461_vm3, %v3263_v11  ;;  %v327_v35 = vsel %vm4163_vm4, %v322_v21, %v326_v1  ;;  %v1423_v38 = vor.u32 %v1422_v22, %v1419_v16  ;;  %v338_v43 = vshll.u32 %v4337_v20, 16  ;;  %v1438_v48 = vrot.slane %v1436_v30, 5  ;;  %v4365_v13 = vld [vmem:[%s4120_s4 + $0x4c] sm:$0xf]  ;;  %v4373_v21 = vld [vmem:[%s5177_s1 + $0x20] ss:$0 sps:$4 sm:$0xff]  }
  0x3e   : > { %v3105_v46 = vcombine.low %v317_v27, %v327_v35  ;;  %v1433_v47 = vor.u32 %v1432_v28, %v1428_v26  ;;  %v331_v44 = vrot.slane %v329_v32, 4  ;;  %v334_v54 = vrot.slane %v332_v42, 5  ;;  %v4378_v42 = vld [vmem:[%s4120_s4 + $0x50] sm:$0x1]  ;;  %3967 = vmatprep.subr.msk.bf16.mxu1 %vm486_vm0, %v4373_v21 }
  0x3f   : > { %v1424_v53 = vrot.slane %v1423_v38, 4  ;;  %v340_v55 = vrot.slane %v338_v43, 5  ;;  %v342_v58 = vshrl.u32 %v4337_v20, 16  ;;  %v348_v1 = vshll.u32 %v4347_v41, 16  ;;  %v4385_v43 = vld [vmem:[%s5177_s1 + $0xd4] ss:$0 sps:$4 sm:$0xff]  }
  0x40   : > { %3612 = vmatprep.mubr.msk.bf16.mxu1 %vm461_vm3, %v3105_v46  ;;  %v1434_v61 = vrot.slane %v1433_v47, 4  ;;  %v1441_v3 = vshrl.u32 %v3242_v45, 16  ;;  %v1444_v8 = vshll.u32 %v3242_v45, 16  ;;  %v335_v16 = vor.u32 %v334_v54, %v331_v44  ;;  %v3245_v44 = vld [vmem:[%s4120_s4 + $0x54] sm:$0xf]  ;;  %3971 = vmatprep.subr.msk.bf16.mxu0 %vm486_vm0, %v4385_v43 }
  0x41   : > { %v1429_v14 = vsel %vm4163_vm4, %v1424_v53, %v1428_v26  ;;  %v344_v5 = vrot.slane %v342_v58, 4  ;;  %v1450_v11 = vshll.u32 %v4353_v49, 16  ;;  %v350_v27 = vrot.slane %v348_v1, 5 }
  0x42   : > { %v1439_v22 = vsel %vm4163_vm4, %v1434_v61, %v1438_v48  ;;  %v1443_v28 = vrot.slane %v1441_v3, 4  ;;  %v1446_v30 = vrot.slane %v1444_v8, 5  ;;  %v336_v35 = vrot.slane %v335_v16, 4  ;;  %v4399_v16 = vld [vmem:[%s4120_s4 + $0x58] sm:$0xf] }
  0x43   : > { %v3264_v32 = vcombine.low %v1429_v14, %v1439_v22  ;;  %v345_v38 = vor.u32 %v344_v5, %v340_v55  ;;  %v1452_v26 = vrot.slane %v1450_v11, 5  ;;  %v1454_v46 = vshrl.u32 %v4353_v49, 16 }
  0x44   : > { %v1447_v45 = vor.u32 %v1446_v30, %v1443_v28  ;;  %v1460_v47 = vshll.u32 %v4357_v59, 16  ;;  %v353_v48 = vshrl.u32 %v4360_v63, 16  ;;  %v341_v53 = vsel %vm4163_vm4, %v336_v35, %v340_v55  ;;  %v4405_v28 = vld [vmem:[%s4120_s4 + $0x5c] sm:$0x1] }
  0x45   : > { %3716 = vmatprep.mubr.msk.bf16.mxu0 %vm461_vm3, %v3264_v32  ;;  %v346_v54 = vrot.slane %v345_v38, 4  ;;  %v356_v58 = vshll.u32 %v4360_v63, 16  ;;  %v362_v61 = vshll.u32 %v4365_v13, 16  ;;  %v1456_v3 = vrot.slane %v1454_v46, 4 }
  0x46   : > { %v1448_v1 = vrot.slane %v1447_v45, 4  ;;  %v1462_v8 = vrot.slane %v1460_v47, 5  ;;  %v355_v14 = vrot.slane %v353_v48, 4  ;;  %v366_v22 = vshrl.u32 %v4365_v13, 16 }
  0x47   : > { %v351_v5 = vsel %vm4163_vm4, %v346_v54, %v350_v27  ;;  %v358_v11 = vrot.slane %v356_v58, 5  ;;  %v364_v55 = vrot.slane %v362_v61, 5  ;;  %v1457_v35 = vor.u32 %v1456_v3, %v1452_v26  ;;  %v4417_v61 = vld [vmem:[%s4120_s4 + $0x58] sm:$0xf] }
  0x48   : > { %v3106_v30 = vcombine.low %v341_v53, %v351_v5  ;;  %v1453_v32 = vsel %vm4163_vm4, %v1448_v1, %v1452_v26  ;;  %v372_v38 = vshll.u32 %v4378_v42, 16  ;;  %v368_v46 = vrot.slane %v366_v22, 4 }
  0x49   : > { %v359_v45 = vor.u32 %v358_v11, %v355_v14  ;;  %v1465_v47 = vshrl.u32 %v3245_v44, 16  ;;  %v1468_v48 = vshll.u32 %v3245_v44, 16  ;;  %v1458_v27 = vrot.slane %v1457_v35, 4 }
  0x4a   : > { %3613 = vmatmul.mubr.msk.bf16.gmra.mrb[8].mxu1 %vm461_vm3, %v3106_v30  ;;  %v374_v54 = vrot.slane %v372_v38, 5  ;;  %v1474_v58 = vshll.u32 %v4399_v16, 16  ;;  %v1478_v53 = vshrl.u32 %v4399_v16, 16  ;;  %v369_v1 = vor.u32 %v368_v46, %v364_v55  ;;  %v4423_v30 = vld [vmem:[%s4120_s4 + $0x5c] sm:$0x1] }
  0x4b   : > { %v360_v26 = vrot.slane %v359_v45, 4  ;;  %v1467_v3 = vrot.slane %v1465_v47, 4  ;;  %v1470_v14 = vrot.slane %v1468_v48, 5  ;;  %v1463_v44 = vsel %vm4163_vm4, %v1458_v27, %v1462_v8  ;;  %5185 = vst [vmem:[#allocation3_spill] sm:$0xff] %v4423_v30  ;;  %v3248_v47 = vld [vmem:[%s4120_s4 + $0x60] sm:$0xf] }
  0x4c   : > { %v1476_v5 = vrot.slane %v1474_v58, 5  ;;  %v1480_v11 = vrot.slane %v1478_v53, 4  ;;  %v1484_v22 = vshll.u32 %v4405_v28, 16  ;;  %v3265_v35 = vcombine.low %v1453_v32, %v1463_v44  ;;  %v4431_v27 = vld [vmem:[%s4120_s4 + $0x64] sm:$0xf] }
  0x4d   : > { %v365_v38 = vsel %vm4163_vm4, %v360_v26, %v364_v55  ;;  %v370_v45 = vrot.slane %v369_v1, 4  ;;  %v1471_v46 = vor.u32 %v1470_v14, %v1467_v3  ;;  %v377_v19 = vshrl.u32 %v4411_v31, 16 }
  0x4e   : > { %v1481_v48 = vor.u32 %v1480_v11, %v1476_v5  ;;  %v1486_v37 = vrot.slane %v1484_v22, 5  ;;  %v380_v8 = vshll.u32 %v4411_v31, 16  ;;  %3717 = vmatmul.mubr.msk.bf16.gmra.mrb[8].mxu0 %vm461_vm3, %v3265_v35  ;;  %v386_v55 = vshll.u32 %v4417_v61, 16 }
  0x4f   : > { %v375_v32 = vsel %vm4163_vm4, %v370_v45, %v374_v54  ;;  %v1472_v58 = vrot.slane %v1471_v46, 4  ;;  %v390_v53 = vshrl.u32 %v4417_v61, 16  ;;  %v379_v3 = vrot.slane %v377_v19, 4  ;;  %v4447_v54 = vld [vmem:[%s5177_s1 + $0x48] sm:$0xff]  }
  0x50   : > { %v3107_v26 = vcombine.low %v365_v38, %v375_v32  ;;  %v1482_v1 = vrot.slane %v1481_v48, 4  ;;  %v382_v14 = vrot.slane %v380_v8, 5  ;;  %v388_v11 = vrot.slane %v386_v55, 5  ;;  %v4456_v48 = vld [vmem:[%s5177_s1 + $0xd8] sm:$0xff]  }
  0x51   : > { %v1477_v44 = vsel %vm4163_vm4, %v1472_v58, %v1476_v5  ;;  %v392_v22 = vrot.slane %v390_v53, 4  ;;  %v396_v35 = vshll.u32 %v4423_v30, 16  ;;  %v1489_v45 = vshrl.u32 %v3248_v47, 16  ;;  %v3281_v5 = vld [vmem:[%s4120_s4 + $0xc] sm:$0xe] }
  0x52   : > { %3616 = vmatprep.mubr.msk.bf16.mxu1 %vm461_vm3, %v3107_v26  ;;  %v1487_v19 = vsel %vm4163_vm4, %v1482_v1, %v1486_v37  ;;  %v383_v38 = vor.u32 %v382_v14, %v379_v3  ;;  %v1492_v46 = vshll.u32 %v3248_v47, 16  ;;  %v1498_v55 = vshll.u32 %v4431_v27, 16 }
  0x53   : > { %v3266_v8 = vcombine.low %v1477_v44, %v1487_v19  ;;  %v393_v32 = vor.u32 %v392_v22, %v388_v11  ;;  %v398_v58 = vrot.slane %v396_v35, 5  ;;  %v1491_v31 = vrot.slane %v1489_v45, 4 }
  0x54   : > { %v384_v53 = vrot.slane %v383_v38, 4  ;;  %v1494_v26 = vrot.slane %v1492_v46, 5  ;;  %v1502_v30 = vshrl.u32 %v4431_v27, 16  ;;  %v1500_v47 = vrot.slane %v1498_v55, 5 }
  0x55   : > { %3720 = vmatprep.mubr.msk.bf16.mxu0 %vm461_vm3, %v3266_v8  ;;  %v394_v37 = vrot.slane %v393_v32, 4  ;;  %v1508_v1 = vshll.u32 %v4442_v4, 16  ;;  %v679_v3 = vsel %vm486_vm0, %v4373_v21, 0  ;;  %v1887_v35 = vsel %vm486_vm0, %v4385_v43, 0  ;;  %v3282_v32 = vld [vmem:[%s4120_s4 + $0x18] sm:$0xe] }
  0x56   : > { %v389_v14 = vsel %vm4163_vm4, %v384_v53, %v388_v11  ;;  %v1495_v44 = vor.u32 %v1494_v26, %v1491_v31  ;;  %v1504_v22 = vrot.slane %v1502_v30, 4  ;;  %3629 = vmatpush3.bf16.msra.mxu1 %v679_v3  ;;  %3733 = vmatpush3.bf16.msra.mxu0 %v1887_v35  ;;  %v3289_v11 = vrot.slane %v3281_v5, 9  ;;  %v3283_v26 = vld [vmem:[%s4120_s4 + $0x24] sm:$0xe] }
  0x57   : > { %v399_v21 = vsel %vm4163_vm4, %v394_v37, %v398_v58  ;;  %v1510_v38 = vrot.slane %v1508_v1, 5  ;;  %v5188_v31 = vrot.slane %v4148_v23, 5  ;;  %3646 = vmatprep.subr.bf16.mxu1 %v4447_v54  ;;  %v3123_v8 = vcombine.low %v4158_v33, %v4168_v39  ;;  %3750 = vmatprep.subr.bf16.mxu0 %v4456_v48 }
  0x58   : > { %v3108_v45 = vcombine.low %v389_v14, %v399_v21  ;;  %v1496_v43 = vrot.slane %v1495_v44, 4  ;;  %v1505_v46 = vor.u32 %v1504_v22, %v1500_v47  ;;  %v5190_v5 = vrot.slane %v4151_v24, 5 }
  0x59   : > { %v1749_v30 = vrot.slane %v5188_v31, 4  ;;  %v5189_v55 = vmov %v5188_v31  ;;  %v810_v37 = vrot.slane %v4138_v12, 5  ;;  %v5191_v3 = vrot.slane %v4199_v2, 5  ;;  %v3284_v31 = vld [vmem:[%s4120_s4 + $0x30] sm:$0xe]  ;;  %v4026_v12 = vld [vmem:[%s5177_s1 + $0xfc] sm:$0xff]  }
  0x5a   : > { %v1748_v58 = vsel %vm4470_vm7, %v3289_v11, %v5189_v55  ;;  %3617 = vmatmul.mubr.msk.bf16.gmra.mrb[12].mxu1 %vm461_vm3, %v3108_v45  ;;  %v1501_v33 = vsel %vm4163_vm4, %v1496_v43, %v1500_v47  ;;  %v1506_v1 = vrot.slane %v1505_v46, 4  ;;  %v1757_v24 = vrot.slane %v4206_v6, 5  ;;  %v3285_v43 = vld [vmem:[%s4120_s4 + $0x3c] sm:$0xe]  ;;  %v3286_v55 = vld [vmem:[%s4120_s4 + $0x48] sm:$0xe] }
  0x5b   : > { %v1751_v53 = vsel %vm4470_vm7, %v1749_v30, %v5190_v5  ;;  %v1756_v14 = vrot.slane %v5191_v3, 4  ;;  %v5192_v44 = vcombine.low %v4129_v9, %v4132_v10  ;;  %v3290_v22 = vrot.slane %v3282_v32, 9  ;;  %v4010_v32 = vld [vmem:[%s5177_s1 + $0x50] sm:$0xff]  }
  0x5c   : > { %v3306_v23 = vcombine.low %v1748_v58, %v1751_v53  ;;  %v1761_v35 = vrot.slane %v4236_v52, 5  ;;  %v1511_v21 = vsel %vm4163_vm4, %v1506_v1, %v1510_v38  ;;  %v3291_v47 = vrot.slane %v3283_v26, 9  ;;  %v3287_v5 = vld [vmem:[%s4120_s4 + $0x54] sm:$0xe] }
  0x5d   : > { %3630 = vmatprep.mubr.msk.bf16.mxu1 %vm461_vm3, %v5192_v44  ;;  %v1764_v11 = vrot.slane %v4240_v56, 5  ;;  %v814_v30 = vrot.slane %v4168_v39, 5  ;;  %v3267_v6 = vcombine.low %v1501_v33, %v1511_v21  ;;  %v817_v9 = vrot.slane %v4185_v51, 5 }
  0x5e   : > { %v1763_v45 = vrot.slane %v1761_v35, 4  ;;  %v1768_v10 = vrot.slane %v4284_v50, 5  ;;  %v5193_v52 = vmov %v5191_v3  ;;  %v1758_v56 = vsel %vm4470_vm7, %v1756_v14, %v1757_v24 }
  0x5f   : > { %3721 = vmatmul.mubr.msk.bf16.gmra.mrb[12].mxu0 %vm461_vm3, %v3267_v6  ;;  %v1755_v38 = vsel %vm4470_vm7, %v3290_v22, %v5193_v52  ;;  %v3124_v46 = vcombine.low %v4214_v25, %v4219_v29  ;;  %v1775_v50 = vrot.slane %v4316_v36, 5  ;;  %v1762_v2 = vsel %vm4470_vm7, %v3291_v47, %v1761_v35 }
  0x60   : > { %3734 = vmatprep.mubr.msk.bf16.mxu0 %vm461_vm3, %v3306_v23  ;;  %v1765_v58 = vsel %vm4470_vm7, %v1763_v45, %v1764_v11  ;;  %v3292_v53 = vrot.slane %v3284_v31, 9  ;;  %v1771_v25 = vrot.slane %v4287_v57, 5  ;;  %v3293_v29 = vrot.slane %v3285_v43, 9  ;;  %v4537_v23 = vld [vmem:[%s4120_s4 + $0x60] sm:$0xe] }
  0x61   : > { %v1782_v26 = vrot.slane %v4353_v49, 5  ;;  %v3307_v36 = vcombine.low %v1755_v38, %v1758_v56  ;;  %v1770_v33 = vrot.slane %v1768_v10, 4  ;;  %v1778_v1 = vrot.slane %v4326_v60, 5  ;;  %v4011_v57 = vld [vmem:[%s5177_s1 + $0xe0] sm:$0xff]   ;;  %v4013_v49 = vld [vmem:[%s5177_s1 + $0x58] sm:$0xff]  }
  0x62   : > { %3631 = vmatmul.mubr.msk.bf16.vlgmr.msra.gmra.mrb[0].mxu1 %vm461_vm3, %v3123_v8  ;;  %v3308_v3 = vcombine.low %v1762_v2, %v1765_v58  ;;  %v1777_v8 = vrot.slane %v1775_v50, 4  ;;  %v3294_v14 = vrot.slane %v3286_v55, 9  ;;  %v1789_v24 = vrot.slane %v4399_v16, 5  ;;  %v779_v60 = vld [vmem:[%s4120_s4 + $0xc] sm:$0xe]  ;;  %v4017_v43 = vld [vmem:[%s5177_s1 + $0x60] sm:$0xff]  }
  0x63   : > { %3647 = vmatpush3.bf16.msra.mxu1 %v4447_v54  ;;  %3634 = vmatprep.mubr.msk.bf16.mxu1 %vm461_vm3, %v3124_v46  ;;  %v1784_v44 = vrot.slane %v1782_v26, 4  ;;  %v1785_v54 = vrot.slane %v4357_v59, 5  ;;  %v3295_v22 = vrot.slane %v3287_v5, 9  ;;  %v1796_v35 = vrot.slane %v4431_v27, 5  ;;  %v778_v45 = vld [vmem:[%s4120_s4] sm:$0xe] }
  0x64   : > { %3648 = vmatprep.subr.bf16.mxu1 %v4010_v32  ;;  %v3125_v21 = vcombine.low %v4246_v62, %v4254_v7  ;;  %v3126_v47 = vcombine.low %v4293_v0, %v4303_v17  ;;  %v1791_v11 = vrot.slane %v1789_v24, 4  ;;  %v1792_v31 = vrot.slane %v4405_v28, 5  ;;  %v4569_v0 = vld [vmem:[%s5177_s1 + $0x68] ss:$0 sps:$4 sm:$0xff]   ;;  %v781_v46 = vld [vmem:[%s4120_s4 + $0x24] sm:$0xe] }
  0x65   : > { %v1769_v16 = vsel %vm4470_vm7, %v3292_v53, %v1768_v10  ;;  %v1772_v6 = vsel %vm4470_vm7, %v1770_v33, %v1771_v25  ;;  %v4562_v59 = vsel %vm4470_vm7, %v3293_v29, %v1775_v50  ;;  %v3127_v62 = vcombine.low %v4331_v40, %v4337_v20  ;;  %v4014_v28 = vld [vmem:[%s5177_s1 + $0xe8] sm:$0xff]   ;;  %v4054_v53 = vld [vmem:[%s4120_s4 + $0x4] sm:$0xf]  ;;  %v782_v29 = vld [vmem:[%s4120_s4 + $0x30] sm:$0xe] }
  0x66   : > { %v1779_v10 = vsel %vm4470_vm7, %v1777_v8, %v1778_v1  ;;  %v3296_v52 = vrot.slane %v4537_v23, 9  ;;  %v4584_v38 = vrot.slane %v1796_v35, 4  ;;  %v1799_v56 = vrot.slane %v4442_v4, 5  ;;  %v4023_v4 = vld [vmem:[%s4120_s4 + $0x18] sm:$0xff]  }
  0x67   : > { %3735 = vmatmul.mubr.msk.bf16.vlgmr.msra.gmra.mrb[0].mxu0 %vm461_vm3, %v3307_v36  ;;  %3649 = vmatpush3.bf16.msra.mxu1 %v4010_v32  ;;  %v4592_v32 = vsel %vm4470_vm7, %v3294_v14, %v1782_v26  ;;  %v4596_v50 = vsel %vm4470_vm7, %v1784_v44, %v1785_v54  ;;  %v3144_v55 = vrot.slane %v779_v60, 9  ;;  %v816_v2 = vrot.slane %v814_v30, 4  ;;  %v4018_v60 = vld [vmem:[%s5177_s1 + $0xf0] sm:$0xff]  }
  0x68   : > { %3751 = vmatpush3.bf16.msra.mxu0 %v4456_v48  ;;  %3738 = vmatprep.mubr.msk.bf16.mxu0 %vm461_vm3, %v3308_v3  ;;  %v4602_v48 = vsel %vm4470_vm7, %v3295_v22, %v1789_v24  ;;  %v4606_v58 = vsel %vm4470_vm7, %v1791_v11, %v1792_v31  ;;  %v3143_v5 = vrot.slane %v778_v45, 9  ;;  %v807_v25 = vrot.slane %v4054_v53, 5  ;;  %v783_v3 = vld [vmem:[%s4120_s4 + $0x3c] sm:$0xe]  ;;  %v784_v24 = vld [vmem:[%s4120_s4 + $0x48] sm:$0xe] }
  0x69   : > { %3752 = vmatprep.subr.bf16.mxu0 %v4011_v57  ;;  %3650 = vmatprep.subr.bf16.mxu1 %v4013_v49  ;;  %v3309_v26 = vcombine.low %v1769_v16, %v1772_v6  ;;  %v3128_v36 = vcombine.low %v4360_v63, %v4365_v13  ;;  %v4617_v33 = vsel %vm4470_vm7, %v3144_v55, %v814_v30  ;;  %v3146_v63 = vrot.slane %v781_v46, 9 }
  0x6a   : > { %3635 = vmatmul.mubr.msk.bf16.gmra.mrb[4].mxu1 %vm461_vm3, %v3125_v21  ;;  %v4623_v1 = vsel %vm4470_vm7, %v816_v2, %v817_v9  ;;  %v3310_v8 = vcombine.low %v4562_v59, %v1779_v10  ;;  %v828_v14 = vrot.slane %v4254_v7, 5  ;;  %v3311_v51 = vcombine.low %v4592_v32, %v4596_v50  ;;  %v785_v59 = vld [vmem:[%s4120_s4 + $0x54] sm:$0xe] }
  0x6b   : > { %3651 = vmatpush3.bf16.msra.mxu1 %v4013_v49  ;;  %3638 = vmatprep.mubr.msk.bf16.mxu1 %vm461_vm3, %v3126_v47  ;;  %v3161_v39 = vcombine.low %v4617_v33, %v4623_v1  ;;  %v3312_v30 = vcombine.low %v4602_v48, %v4606_v58  ;;  %v947_v9 = vsel %vm486_vm0, %v4569_v0, 0  ;;  %v831_v49 = vrot.slane %v4262_v15, 5  ;;  %v4654_v15 = vld [vmem:[%s5177_s1 + $0x6c] sm:$0xff]   ;;  %v4027_v58 = vld [vmem:[%s5177_s1 + $0x74] sm:$0xff]   ;;  %v4031_v33 = vld [vmem:[%s5177_s1 + $0x7c] sm:$0xff]  }
  0x6c   : > { %3753 = vmatpush3.bf16.msra.mxu0 %v4011_v57  ;;  %3652 = vmatprep.subr.bf16.mxu1 %v4017_v43  ;;  %v4644_v7 = vsel %vm4470_vm7, %v3146_v63, %v828_v14  ;;  %v830_v57 = vrot.slane %v828_v14, 4  ;;  %v3147_v44 = vrot.slane %v782_v29, 9  ;;  %v835_v54 = vrot.slane %v4303_v17, 5  ;;  %v780_v14 = vld [vmem:[%s4120_s4 + $0x18] sm:$0xe] }
  0x6d   : > { %3754 = vmatprep.subr.bf16.mxu0 %v4014_v28  ;;  %v4649_v22 = vsel %vm4470_vm7, %v3143_v5, %v807_v25  ;;  %v838_v21 = vrot.slane %v4306_v18, 5  ;;  %v3148_v47 = vrot.slane %v783_v3, 9  ;;  %v842_v11 = vrot.slane %v4337_v20, 5 }
  0x6e   : > { %v809_v31 = vrot.slane %v807_v25, 4  ;;  %v4661_v17 = vsel %vm4470_vm7, %v830_v57, %v831_v49  ;;  %v4665_v16 = vsel %vm4470_vm7, %v3147_v44, %v835_v54  ;;  %v837_v6 = vrot.slane %v835_v54, 4  ;;  %v4025_v54 = vld [vmem:[%s4120_s4 + $0x24] sm:$0xff]  }
  0x6f   : > { %3739 = vmatmul.mubr.msk.bf16.gmra.mrb[4].mxu0 %vm461_vm3, %v3309_v26  ;;  %3653 = vmatpush3.bf16.msra.mxu1 %v4017_v43  ;;  %v3163_v18 = vcombine.low %v4644_v7, %v4661_v17  ;;  %v4673_v45 = vsel %vm4470_vm7, %v3148_v47, %v842_v11  ;;  %v844_v10 = vrot.slane %v842_v11, 4  ;;  %v845_v43 = vrot.slane %v4347_v41, 5  ;;  %v4055_v26 = vld [vmem:[%s4120_s4 + $0x1c] sm:$0xf]  ;;  %v3376_v11 = vld [vmem:[%s4120_s4 + $0x24] sm:$0xf] }
  0x70   : > { %3755 = vmatpush3.bf16.msra.mxu0 %v4014_v28  ;;  %3742 = vmatprep.mubr.msk.bf16.mxu0 %vm461_vm3, %v3310_v8  ;;  %v4022_v28 = vld [vmem:[%s5177_s1 + $0xf8] ss:$0 sps:$4 sm:$0xff]   ;;  %v4683_v46 = vsel %vm4470_vm7, %v837_v6, %v838_v21  ;;  %v3149_v55 = vrot.slane %v784_v24, 9  ;;  %v849_v2 = vrot.slane %v4365_v13, 5  ;;  %v852_v5 = vrot.slane %v4378_v42, 5  ;;  %v5194_v42 = vld [vmem:[#allocation3_spill] sm:$0xff] }
  0x71   : > { %3756 = vmatprep.subr.bf16.mxu0 %v4018_v60  ;;  %3968 = vmatprep.subr.msk.bf16.mxu1 %vm486_vm0, %v4569_v0  ;;  %v3164_v41 = vcombine.low %v4665_v16, %v4683_v46  ;;  %v4695_v0 = vsel %vm4470_vm7, %v844_v10, %v845_v43  ;;  %v3150_v53 = vrot.slane %v785_v59, 9  ;;  %v856_v25 = vrot.slane %v4417_v61, 5  ;;  %v4029_v21 = vld [vmem:[%s5177_s1 + $0x104] sm:$0xff]   ;;  %v4032_v6 = vld [vmem:[%s5177_s1 + $0x10c] sm:$0xff]   ;;  %v4030_v10 = vld [vmem:[%s4120_s4 + $0x3c] sm:$0xff]  }
  0x72   : > { %3639 = vmatmul.mubr.msk.bf16.gmra.mrb[8].mxu1 %vm461_vm3, %v3127_v62  ;;  %v3165_v13 = vcombine.low %v4673_v45, %v4695_v0  ;;  %v4703_v40 = vsel %vm4470_vm7, %v3149_v55, %v849_v2  ;;  %v851_v20 = vrot.slane %v849_v2, 4  ;;  %v859_v62 = vrot.slane %v5194_v42, 5  ;;  %v4035_v59 = vld [vmem:[%s5177_s1 + $0x84] sm:$0xff]   ;;  %v4803_v43 = vld [vmem:[%s4120_s4 + $0x20] sm:$0x1] }
  0x73   : > { %3642 = vmatprep.mubr.msk.bf16.mxu1 %vm461_vm3, %v3128_v36  ;;  %3655 = vmatpush3.bf16.msra.mxu1 %v947_v9  ;;  %v811_v29 = vsel %vm4470_vm7, %v809_v31, %v810_v37  ;;  %v821_v36 = vrot.slane %v4055_v26, 5  ;;  %v4714_v3 = vsel %vm4470_vm7, %v3150_v53, %v856_v25  ;;  %v858_v8 = vrot.slane %v856_v25, 4  ;;  %v5195_v9 = vld [vmem:[#allocation2_spill] sm:$0xff]  ;;  %v4792_v31 = vld [vmem:[%s4120_s4 + $0x28] sm:$0xf] }
  0x74   : > { %3757 = vmatpush3.bf16.msra.mxu0 %v4018_v60  ;;  %3672 = vmatprep.subr.bf16.mxu1 %v4654_v15  ;;  %v2121_v63 = vsel %vm486_vm0, %v4022_v28, 0  ;;  %v4724_v37 = vsel %vm4470_vm7, %v851_v20, %v852_v5  ;;  %v3129_v49 = vcombine.low %v5195_v9, %v4417_v61  ;;  %v1797_v61 = vsel %vm4470_vm7, %v3296_v52, %v1796_v35  ;;  %v4056_v52 = vld [vmem:[%s4120_s4 + $0x20] sm:$0x1]  ;;  %v4033_v53 = vld [vmem:[%s4120_s4 + $0x48] sm:$0xff]   ;;  %v4040_v17 = vld [vmem:[%s5177_s1 + $0x11c] ss:$0 sps:$4 sm:$0xff]  }
  0x75   : > { %3972 = vmatprep.subr.msk.bf16.mxu0 %vm486_vm0, %v4022_v28  ;;  %v3166_v24 = vcombine.low %v4703_v40, %v4724_v37  ;;  %v4732_v60 = vsel %vm4470_vm7, %v858_v8, %v859_v62  ;;  %v3160_v57 = vcombine.low %v4649_v22, %v811_v29  ;;  %v1800_v27 = vsel %vm4470_vm7, %v4584_v38, %v1799_v56  ;;  %v4028_v22 = vld [vmem:[%s4120_s4 + $0x30] sm:$0xff]   ;;  %v4039_v7 = vld [vmem:[%s5177_s1 + $0x8c] ss:$0 sps:$4 sm:$0xff]   ;;  %v4037_v45 = vld [vmem:[%s4120_s4 + $0x60] sm:$0xff]  }
  0x76   : > { %v3167_v44 = vcombine.low %v4714_v3, %v4732_v60  ;;  %v3145_v23 = vrot.slane %v780_v14, 9  ;;  %v823_v35 = vrot.slane %v821_v36, 4  ;;  %v824_v32 = vrot.slane %v4056_v52, 5  ;;  %v4036_v29 = vld [vmem:[%s5177_s1 + $0x114] sm:$0xff]  }
  0x77   : > { %3743 = vmatmul.mubr.msk.bf16.gmra.mrb[8].mxu0 %vm461_vm3, %v3311_v51  ;;  %v3313_v50 = vcombine.low %v1797_v61, %v1800_v27  ;;  %v3373_v51 = vld [vmem:[%s4120_s4 + $0x18] sm:$0xf]  ;;  %v2285_v25 = vshrl.u32 %v3376_v11, 16  ;;  %v2288_v20 = vshll.u32 %v3376_v11, 16  ;;  %v2294_v42 = vshll.u32 %v4792_v31, 16  ;;  %v4845_v27 = vld [vmem:[%s5177_s1 + $0x120] sm:$0xff]  }
  0x78   : > { %3746 = vmatprep.mubr.msk.bf16.mxu0 %vm461_vm3, %v3312_v30  ;;  %3759 = vmatpush3.bf16.msra.mxu0 %v2121_v63  ;;  %v822_v48 = vsel %vm4470_vm7, %v3145_v23, %v821_v36  ;;  %v825_v38 = vsel %vm4470_vm7, %v823_v35, %v824_v32  ;;  %v4775_v30 = vld [vmem:[%s4120_s4 + $0x1c] sm:$0xf]  ;;  %v2261_v1 = vshrl.u32 %v3373_v51, 16  ;;  %v2298_v62 = vshrl.u32 %v4792_v31, 16  ;;  %v4834_v36 = vld [vmem:[%s4120_s4 + $0x2c] sm:$0x1] }
  0x79   : > { %3776 = vmatprep.subr.bf16.mxu0 %v4026_v12  ;;  %v3162_v56 = vcombine.low %v822_v48, %v825_v38  ;;  %v2270_v47 = vshll.u32 %v4775_v30, 16  ;;  %v2280_v46 = vshll.u32 %v4803_v43, 16  ;;  %v2287_v8 = vrot.slane %v2285_v25, 4  ;;  %v3382_v48 = vld [vmem:[%s4120_s4 + $0x3c] sm:$0xf] }
  0x7a   : > { %3643 = vmatmul.mubr.msk.bf16.gmra.mrb[12].mxu1 %vm461_vm3, %v3129_v49  ;;  %v2263_v28 = vrot.slane %v2261_v1, 4  ;;  %v2290_v63 = vrot.slane %v2288_v20, 5  ;;  %v2300_v14 = vrot.slane %v2298_v62, 4  ;;  %v1181_v61 = vsel %vm486_vm0, %v4039_v7, 0  ;;  %v4857_v38 = vld [vmem:[%s4120_s4 + $0x40] sm:$0xf] }
  0x7b   : > { %3656 = vmatprep.mubr.msk.bf16.mxu1 %vm461_vm3, %v3160_v57  ;;  %v4805_v2 = vrot.slane %v2270_v47, 5  ;;  %v2538_v57 = vsel %vm486_vm0, %v4040_v17, 0  ;;  %v2333_v40 = vshrl.u32 %v3382_v48, 16  ;;  %v2336_v37 = vshll.u32 %v3382_v48, 16  ;;  %v4931_v48 = vld [vmem:[%s4120_s4 + $0x64] sm:$0xf] }
  0x7c   : > { %v2342_v1 = vshll.u32 %v4857_v38, 16 }
  0x7d   : > { %v2335_v62 = vrot.slane %v2333_v40, 4 }
  0x7f   : > { %3747 = vmatmul.mubr.msk.bf16.gmra.mrb[12].mxu0 %vm461_vm3, %v3313_v50  ;;  %v2282_v50 = vrot.slane %v2280_v46, 5 }
  0x80   : > { %3760 = vmatprep.mubr.msk.bf16.mxu0 %vm461_vm3, %v4023_v4  ;;  %v2304_v4 = vshll.u32 %v4834_v36, 16 }
  0x82   : > { %3657 = vmatmul.mubr.msk.bf16.vlgmr.msra.gmra.mrb[0].mxu1 %vm461_vm3, %v3161_v39  ;;  %v2264_v39 = vshll.u32 %v3373_v51, 16  ;;  %v2291_v51 = vor.u32 %v2290_v63, %v2287_v8  ;;  %v3388_v63 = vld [vmem:[%s4120_s4 + $0x54] sm:$0xf] }
  0x83   : > { %3673 = vmatpush3.bf16.msra.mxu1 %v4654_v15  ;;  %3660 = vmatprep.mubr.msk.bf16.mxu1 %vm461_vm3, %v3162_v56  ;;  %v2274_v15 = vshrl.u32 %v4775_v30, 16  ;;  %v3385_v56 = vld [vmem:[%s4120_s4 + $0x48] sm:$0xf] }
  0x84   : > { %3674 = vmatprep.subr.bf16.mxu1 %v4027_v58  ;;  %v2266_v55 = vrot.slane %v2264_v39, 5  ;;  %v2346_v39 = vshrl.u32 %v4857_v38, 16  ;;  %v2357_v47 = vshrl.u32 %v3385_v56, 16 }
  0x85   : > { %v2276_v5 = vrot.slane %v2274_v15, 4  ;;  %v2360_v15 = vshll.u32 %v3385_v56, 16  ;;  %v4042_v56 = vld [vmem:[%s4120_s4 + $0x18] sm:$0xff]  }
  0x86   : > { %v2267_v26 = vor.u32 %v2266_v55, %v2263_v28  ;;  %v4041_v28 = vld [vmem:[%s4120_s4 + $0xc] sm:$0xff]  }
  0x87   : > { %3761 = vmatmul.mubr.msk.bf16.vlgmr.msra.gmra.mrb[0].mxu0 %vm461_vm3, %v4025_v54  ;;  %3675 = vmatpush3.bf16.msra.mxu1 %v4027_v58  ;;  %v2277_v16 = vor.u32 %v2276_v5, %v4805_v2  ;;  %v4034_v58 = vld [vmem:[%s4120_s4 + $0x54] sm:$0xff]   ;;  %v4890_v5 = vrot.slane %v2291_v51, 4  ;;  %v2384_v51 = vshll.u32 %v3388_v63, 16 }
  0x88   : > { %3777 = vmatpush3.bf16.msra.mxu0 %v4026_v12  ;;  %3764 = vmatprep.mubr.msk.bf16.mxu0 %vm461_vm3, %v4028_v22  ;;  %v4836_v12 = vrot.slane %v2294_v42, 5  ;;  %v2268_v52 = vrot.slane %v2267_v26, 4  ;;  %v4898_v42 = vld [vmem:[%s4120_s4 + $0x44] sm:$0x1]  ;;  %v2362_v26 = vrot.slane %v2360_v15, 5  ;;  %v2414_v15 = vshll.u32 %v4931_v48, 16 }
  0x89   : > { %3778 = vmatprep.subr.bf16.mxu0 %v4029_v21  ;;  %3676 = vmatprep.subr.bf16.mxu1 %v4031_v33  ;;  %v2278_v32 = vrot.slane %v2277_v16, 4  ;;  %v4908_v16 = vld [vmem:[%s4120_s4 + $0x50] sm:$0x1] }
  0x8a   : > { %3661 = vmatmul.mubr.msk.bf16.gmra.mrb[4].mxu1 %vm461_vm3, %v3163_v18  ;;  %v3379_v18 = vld [vmem:[%s4120_s4 + $0x30] sm:$0xf]  ;;  %v2301_v54 = vor.u32 %v2300_v14, %v4836_v12  ;;  %v2273_v11 = vsel %vm4163_vm4, %v2268_v52, %v4805_v2  ;;  %v2297_v3 = vsel %vm4163_vm4, %v4890_v5, %v4836_v12  ;;  %v3391_v52 = vld [vmem:[%s4120_s4 + $0x60] sm:$0xf]  ;;  %v2376_v12 = vshll.u32 %v4908_v16, 16 }
  0x8b   : > { %3677 = vmatpush3.bf16.msra.mxu1 %v4031_v33  ;;  %3664 = vmatprep.mubr.msk.bf16.mxu1 %vm461_vm3, %v3164_v41  ;;  %v4831_v41 = vld [vmem:[%s4120_s4 + $0x34] sm:$0xf]  ;;  %v2309_v9 = vshrl.u32 %v3379_v18, 16  ;;  %v2312_v49 = vshll.u32 %v3379_v18, 16  ;;  %v4867_v33 = vld [vmem:[%s4120_s4 + $0x4c] sm:$0xf]  ;;  %v2283_v55 = vsel %vm4163_vm4, %v2278_v32, %v2282_v50 }
  0x8c   : > { %3779 = vmatpush3.bf16.msra.mxu0 %v4029_v21  ;;  %3678 = vmatprep.subr.bf16.mxu1 %v4035_v59  ;;  %v2318_v23 = vshll.u32 %v4831_v41, 16  ;;  %v2322_v35 = vshrl.u32 %v4831_v41, 16  ;;  %v2348_v18 = vrot.slane %v2346_v39, 4  ;;  %v4038_v14 = vld [vmem:[%s4120_s4 + $0x6c] sm:$0xff]   ;;  %v2405_v40 = vshrl.u32 %v3391_v52, 16 }
  0x8d   : > { %3780 = vmatprep.subr.bf16.mxu0 %v4032_v6  ;;  %v2311_v22 = vrot.slane %v2309_v9, 4  ;;  %v2314_v21 = vrot.slane %v2312_v49, 5  ;;  %v3406_v9 = vcombine.low %v2273_v11, %v2283_v55  ;;  %v4921_v49 = vld [vmem:[%s4120_s4 + $0x58] sm:$0xf]  ;;  %v4948_v39 = vld [vmem:[%s5177_s1 + $0x128] sm:$0xff]   ;;  %v2418_v11 = vshrl.u32 %v4931_v48, 16 }
  0x8e   : > { %v4871_v0 = vrot.slane %v2318_v23, 5  ;;  %v4954_v55 = vld [vmem:[%s4120_s4 + $0x5c] sm:$0x1]  ;;  %v2386_v5 = vrot.slane %v2384_v51, 5 }
  0x8f   : > { %3765 = vmatmul.mubr.msk.bf16.gmra.mrb[4].mxu0 %vm461_vm3, %v4030_v10  ;;  %3679 = vmatpush3.bf16.msra.mxu1 %v4035_v59  ;;  %v2366_v59 = vshll.u32 %v4867_v33, 16  ;;  %v2370_v10 = vshrl.u32 %v4867_v33, 16  ;;  %v2315_v25 = vor.u32 %v2314_v21, %v2311_v22  ;;  %v2394_v22 = vshrl.u32 %v4921_v49, 16  ;;  %v4044_v21 = vld [vmem:[%s4120_s4 + $0x24] sm:$0xff]  }
  0x90   : > { %3781 = vmatpush3.bf16.msra.mxu0 %v4032_v6  ;;  %3768 = vmatprep.mubr.msk.bf16.mxu0 %vm461_vm3, %v4033_v53  ;;  %v4882_v6 = vrot.slane %v2304_v4, 5  ;;  %v4892_v53 = vrot.slane %v2301_v54, 4  ;;  %v2381_v4 = vshrl.u32 %v3388_v63, 16  ;;  %v2390_v54 = vshll.u32 %v4921_v49, 16 }
  0x91   : > { %3782 = vmatprep.subr.bf16.mxu0 %v4036_v29  ;;  %3969 = vmatprep.subr.msk.bf16.mxu1 %vm486_vm0, %v4039_v7  ;;  %v2338_v7 = vrot.slane %v2336_v37, 5  ;;  %v4910_v46 = vrot.slane %v2366_v59, 5  ;;  %v2372_v8 = vrot.slane %v2370_v10, 4  ;;  %v2316_v60 = vrot.slane %v2315_v25, 4 }
  0x92   : > { %3665 = vmatmul.mubr.msk.bf16.gmra.mrb[8].mxu1 %vm461_vm3, %v3165_v13  ;;  %v2324_v13 = vrot.slane %v2322_v35, 4  ;;  %v2408_v37 = vshll.u32 %v3391_v52, 16  ;;  %v2378_v59 = vrot.slane %v2376_v12, 5  ;;  %v2383_v10 = vrot.slane %v2381_v4, 4 }
  0x93   : > { %3668 = vmatprep.mubr.msk.bf16.mxu1 %vm461_vm3, %v3166_v24  ;;  %3681 = vmatpush3.bf16.msra.mxu1 %v1181_v61  ;;  %v4875_v24 = vld [vmem:[%s4120_s4 + $0x38] sm:$0x1]  ;;  %v2307_v61 = vsel %vm4163_vm4, %v4892_v53, %v4882_v6  ;;  %v2339_v35 = vor.u32 %v2338_v7, %v2335_v62  ;;  %v4956_v53 = vrot.slane %v2390_v54, 5  ;;  %v2396_v25 = vrot.slane %v2394_v22, 4 }
  0x94   : > { %3783 = vmatpush3.bf16.msra.mxu0 %v4036_v29  ;;  %3828 = vmatprep.subr.bf16.mxu1 %v4845_v27  ;;  %v2325_v2 = vor.u32 %v2324_v13, %v4871_v0  ;;  %v2328_v20 = vshll.u32 %v4875_v24, 16  ;;  %v2359_v29 = vrot.slane %v2357_v47, 4  ;;  %v2410_v62 = vrot.slane %v2408_v37, 5 }
  0x95   : > { %3973 = vmatprep.subr.msk.bf16.mxu0 %vm486_vm0, %v4040_v17  ;;  %v4901_v17 = vrot.slane %v2342_v1, 5  ;;  %v2340_v47 = vrot.slane %v2339_v35, 4  ;;  %v4048_v35 = vld [vmem:[%s4120_s4 + $0x3c] sm:$0xff]  }
  0x96   : > { %v2330_v23 = vrot.slane %v2328_v20, 5  ;;  %v2363_v50 = vor.u32 %v2362_v26, %v2359_v29  ;;  %v2407_v20 = vrot.slane %v2405_v40, 4  ;;  %v4964_v29 = vrot.slane %v2414_v15, 5 }
  0x97   : > { %3769 = vmatmul.mubr.msk.bf16.gmra.mrb[8].mxu0 %vm461_vm3, %v4034_v58  ;;  %v2349_v32 = vor.u32 %v2348_v18, %v4901_v17  ;;  %v2373_v58 = vor.u32 %v2372_v8, %v4910_v46  ;;  %v4962_v18 = vld [vmem:[%s4120_s4 + $0x68] sm:$0x1]  ;;  %v2420_v26 = vrot.slane %v2418_v11, 4  ;;  %v3394_v8 = vld [vmem:[%s4120_s4 + $0x6c] sm:$0xf]  ;;  %v2345_v63 = vsel %vm4163_vm4, %v2340_v47, %v4901_v17 }
  0x98   : > { %3772 = vmatprep.mubr.msk.bf16.mxu0 %vm461_vm3, %v4037_v45  ;;  %3785 = vmatpush3.bf16.msra.mxu0 %v2538_v57  ;;  %v2326_v57 = vrot.slane %v2325_v2, 4  ;;  %v2321_v45 = vsel %vm4163_vm4, %v2316_v60, %v4871_v0  ;;  %v2364_v6 = vrot.slane %v2363_v50, 4  ;;  %v3407_v2 = vcombine.low %v2297_v3, %v2307_v61  ;;  %v4977_v60 = vld [vmem:[%s4120_s4 + $0x70] sm:$0xf]  ;;  %v4053_v47 = vld [vmem:[%s5177_s1 + $0x140] ss:$0 sps:$4 sm:$0xff]  }
  0x99   : > { %3802 = vmatprep.subr.bf16.mxu0 %v4845_v27  ;;  %v2350_v0 = vrot.slane %v2349_v32, 4  ;;  %v2400_v3 = vshll.u32 %v4954_v55, 16  ;;  %v2387_v17 = vor.u32 %v2386_v5, %v2383_v10  ;;  %v2411_v52 = vor.u32 %v2410_v62, %v2407_v20  ;;  %v4049_v10 = vld [vmem:[%s4120_s4 + $0x48] sm:$0xff]  }
  0x9a   : > { %3669 = vmatmul.mubr.msk.bf16.gmra.mrb[12].mxu1 %vm461_vm3, %v3167_v44  ;;  %v2352_v44 = vshll.u32 %v4898_v42, 16  ;;  %v2331_v1 = vsel %vm4163_vm4, %v2326_v57, %v2330_v23  ;;  %v2369_v61 = vsel %vm4163_vm4, %v2364_v6, %v4910_v46  ;;  %v2397_v23 = vor.u32 %v2396_v25, %v4956_v53  ;;  %v4050_v46 = vld [vmem:[%s5177_s1 + $0x138] sm:$0xff]   ;;  %v3431_v6 = vld [vmem:[%s4120_s4 + $0x48] sm:$0xe] }
  0x9b   : > { %3682 = vmatprep.mubr.msk.bf16.mxu1 %vm461_vm3, %v4041_v28  ;;  %v2374_v28 = vrot.slane %v2373_v58, 4  ;;  %v3408_v7 = vcombine.low %v2321_v45, %v2331_v1  ;;  %v2424_v32 = vshll.u32 %v4962_v18, 16  ;;  %v2429_v50 = vshrl.u32 %v3394_v8, 16  ;;  %v5001_v45 = vld [vmem:[%s4120_s4 + $0x74] sm:$0x1] }
  0x9c   : > { %v2354_v13 = vrot.slane %v2352_v44, 5  ;;  %v4046_v44 = vld [vmem:[%s4120_s4 + $0x30] sm:$0xff]   ;;  %v2432_v12 = vshll.u32 %v3394_v8, 16  ;;  %v2421_v4 = vor.u32 %v2420_v26, %v4964_v29  ;;  %v2442_v58 = vshrl.u32 %v4977_v60, 16 }
  0x9d   : > { %v2379_v57 = vsel %vm4163_vm4, %v2374_v28, %v2378_v59  ;;  %v2398_v22 = vrot.slane %v2397_v23, 4  ;;  %v2426_v40 = vrot.slane %v2424_v32, 5  ;;  %v2431_v37 = vrot.slane %v2429_v50, 4 }
  0x9e   : > { %v3410_v54 = vcombine.low %v2369_v61, %v2379_v57  ;;  %v2434_v1 = vrot.slane %v2432_v12, 5  ;;  %v2422_v15 = vrot.slane %v2421_v4, 4  ;;  %v2715_v59 = vrot.slane %v4867_v33, 5  ;;  %v4052_v12 = vld [vmem:[%s4120_s4 + $0x60] sm:$0xff]  }
  0x9f   : > { %3773 = vmatmul.mubr.msk.bf16.gmra.mrb[12].mxu0 %vm461_vm3, %v4038_v14  ;;  %v2355_v14 = vsel %vm4163_vm4, %v2350_v0, %v2354_v13  ;;  %v2412_v13 = vrot.slane %v2411_v52, 4  ;;  %v2444_v0 = vrot.slane %v2442_v58, 4  ;;  %v2687_v25 = vrot.slane %v4775_v30, 5  ;;  %v3433_v52 = vld [vmem:[%s4120_s4 + $0x60] sm:$0xe] }
  0xa0   : > { %3786 = vmatprep.mubr.msk.bf16.mxu0 %vm461_vm3, %v3406_v9  ;;  %v4047_v9 = vld [vmem:[%s5177_s1 + $0x130] sm:$0xff]   ;;  %v3409_v51 = vcombine.low %v2345_v63, %v2355_v14  ;;  %v2435_v20 = vor.u32 %v2434_v1, %v2431_v37  ;;  %v2827_v62 = vsel %vm486_vm0, %v4053_v47, 0  ;;  %v2427_v26 = vsel %vm4163_vm4, %v2422_v15, %v2426_v40  ;;  %v3428_v58 = vld [vmem:[%s4120_s4 + $0x24] sm:$0xe] }
  0xa1   : > { %v2417_v33 = vsel %vm4163_vm4, %v2412_v13, %v4964_v29  ;;  %v2717_v8 = vrot.slane %v2715_v59, 4  ;;  %v2718_v63 = vrot.slane %v4908_v16, 5  ;;  %v2722_v29 = vrot.slane %v4921_v49, 5  ;;  %v3429_v1 = vld [vmem:[%s4120_s4 + $0x30] sm:$0xe] }
  0xa2   : > { %3683 = vmatmul.mubr.msk.bf16.vlgmr.msra.gmra.mrb[0].mxu1 %vm461_vm3, %v4042_v56  ;;  %v2438_v56 = vshll.u32 %v4977_v60, 16  ;;  %v3412_v61 = vcombine.low %v2417_v33, %v2427_v26  ;;  %v2436_v57 = vrot.slane %v2435_v20, 4  ;;  %v2725_v50 = vrot.slane %v4954_v55, 5 }
  0xa3   : > { %3833 = vmatpush3.bf16.msra.mxu1 %v4845_v27  ;;  %3686 = vmatprep.mubr.msk.bf16.mxu1 %vm461_vm3, %v4044_v21  ;;  %v2402_v21 = vrot.slane %v2400_v3, 5  ;;  %v2690_v3 = vrot.slane %v4803_v43, 5  ;;  %v2719_v49 = vsel %vm4470_vm7, %v2717_v8, %v2718_v63  ;;  %v2729_v43 = vrot.slane %v4931_v48, 5 }
  0xa4   : > { %3829 = vmatprep.subr.bf16.mxu1 %v4948_v39  ;;  %v5008_v11 = vrot.slane %v2438_v56, 5  ;;  %v2724_v32 = vrot.slane %v2722_v29, 4  ;;  %v2701_v13 = vrot.slane %v4831_v41, 5  ;;  %v3436_v37 = vrot.slane %v3428_v58, 9 }
  0xa5   : > { %v2403_v5 = vsel %vm4163_vm4, %v2398_v22, %v2402_v21  ;;  %v2731_v22 = vrot.slane %v2729_v43, 4  ;;  %v2732_v21 = vrot.slane %v4962_v18, 5  ;;  %v2736_v15 = vrot.slane %v4977_v60, 5 }
  0xa6   : > { %v2445_v30 = vor.u32 %v2444_v0, %v5008_v11  ;;  %v2441_v48 = vsel %vm4163_vm4, %v2436_v57, %v5008_v11  ;;  %v2697_v18 = vrot.slane %v4834_v36, 5  ;;  %v2739_v36 = vrot.slane %v5001_v45, 5 }
  0xa7   : > { %3787 = vmatmul.mubr.msk.bf16.vlgmr.msra.gmra.mrb[0].mxu0 %vm461_vm3, %v3407_v2  ;;  %3834 = vmatpush3.bf16.msra.mxu1 %v4948_v39  ;;  %v4051_v2 = vld [vmem:[%s4120_s4 + $0x54] sm:$0xff]   ;;  %v2733_v0 = vsel %vm4470_vm7, %v2731_v22, %v2732_v21  ;;  %v2708_v20 = vrot.slane %v4857_v38, 5  ;;  %v2711_v63 = vrot.slane %v4898_v42, 5 }
  0xa8   : > { %3803 = vmatpush3.bf16.msra.mxu0 %v4845_v27  ;;  %3790 = vmatprep.mubr.msk.bf16.mxu0 %vm461_vm3, %v3408_v7  ;;  %v2388_v27 = vrot.slane %v2387_v17, 4  ;;  %v3427_v7 = vld [vmem:[%s4120_s4 + $0x18] sm:$0xe]  ;;  %v2446_v17 = vrot.slane %v2445_v30, 4 }
  0xa9   : > { %3804 = vmatprep.subr.bf16.mxu0 %v4948_v39  ;;  %3830 = vmatprep.subr.bf16.mxu1 %v4047_v9  ;;  %v3435_v14 = vrot.slane %v3427_v7, 9  ;;  %v3430_v7 = vld [vmem:[%s4120_s4 + $0x3c] sm:$0xe]  ;;  %v2710_v8 = vrot.slane %v2708_v20, 4 }
  0xaa   : > { %3687 = vmatmul.mubr.msk.bf16.gmra.mrb[4].mxu1 %vm461_vm3, %v4046_v44  ;;  %v2393_v28 = vsel %vm4163_vm4, %v2388_v27, %v4956_v53  ;;  %v3439_v53 = vrot.slane %v3431_v6, 9  ;;  %v3441_v27 = vrot.slane %v3433_v52, 9  ;;  %v3434_v6 = vld [vmem:[%s4120_s4 + $0x6c] sm:$0xe]  ;;  %v3438_v38 = vrot.slane %v3430_v7, 9 }
  0xab   : > { %3835 = vmatpush3.bf16.msra.mxu1 %v4047_v9  ;;  %3690 = vmatprep.mubr.msk.bf16.mxu1 %vm461_vm3, %v4048_v35  ;;  %v3411_v44 = vcombine.low %v2393_v28, %v2403_v5  ;;  %v3432_v35 = vld [vmem:[%s4120_s4 + $0x54] sm:$0xe]  ;;  %v2704_v28 = vrot.slane %v4875_v24, 5  ;;  %v3442_v60 = vrot.slane %v3434_v6, 9 }
  0xac   : > { %3805 = vmatpush3.bf16.msra.mxu0 %v4948_v39  ;;  %3831 = vmatprep.subr.bf16.mxu1 %v4050_v46  ;;  %v2448_v39 = vshll.u32 %v5001_v45, 16  ;;  %v2716_v23 = vsel %vm4470_vm7, %v3439_v53, %v2715_v59  ;;  %v2730_v41 = vsel %vm4470_vm7, %v3441_v27, %v2729_v43  ;;  %v3437_v59 = vrot.slane %v3429_v1, 9 }
  0xad   : > { %3806 = vmatprep.subr.bf16.mxu0 %v4047_v9  ;;  %v3456_v56 = vcombine.low %v2716_v23, %v2719_v49  ;;  %v2737_v53 = vsel %vm4470_vm7, %v3442_v60, %v2736_v15 }
  0xae   : > { %v2450_v16 = vrot.slane %v2448_v39, 5  ;;  %v3458_v39 = vcombine.low %v2730_v41, %v2733_v0  ;;  %v2702_v24 = vsel %vm4470_vm7, %v3437_v59, %v2701_v13 }
  0xaf   : > { %3791 = vmatmul.mubr.msk.bf16.gmra.mrb[4].mxu0 %vm461_vm3, %v3409_v51  ;;  %3836 = vmatpush3.bf16.msra.mxu1 %v4050_v46  ;;  %v2694_v51 = vrot.slane %v4792_v31, 5 }
  0xb0   : > { %3807 = vmatpush3.bf16.msra.mxu0 %v4047_v9  ;;  %3794 = vmatprep.mubr.msk.bf16.mxu0 %vm461_vm3, %v3410_v54  ;;  %v2689_v9 = vrot.slane %v2687_v25, 4  ;;  %v3440_v54 = vrot.slane %v3432_v35, 9  ;;  %v2451_v55 = vsel %vm4163_vm4, %v2446_v17, %v2450_v16 }
  0xb1   : > { %3808 = vmatprep.subr.bf16.mxu0 %v4050_v46  ;;  %3975 = vmatprep.subr.msk.bf16.mxu1 %vm486_vm0, %v4053_v47  ;;  %v3413_v31 = vcombine.low %v2441_v48, %v2451_v55  ;;  %v2696_v11 = vrot.slane %v2694_v51, 4 }
  0xb2   : > { %3691 = vmatmul.mubr.msk.bf16.gmra.mrb[8].mxu1 %vm461_vm3, %v4049_v10  ;;  %v2691_v4 = vsel %vm4470_vm7, %v2689_v9, %v2690_v3  ;;  %v2723_v34 = vsel %vm4470_vm7, %v3440_v54, %v2722_v29  ;;  %v2703_v10 = vrot.slane %v2701_v13, 4  ;;  %v2712_v9 = vsel %vm4470_vm7, %v2710_v8, %v2711_v63 }
  0xb3   : > { %3694 = vmatprep.mubr.msk.bf16.mxu1 %vm461_vm3, %v4051_v2  ;;  %3837 = vmatpush3.bf16.msra.mxu1 %v2827_v62  ;;  %v2695_v2 = vsel %vm4470_vm7, %v3436_v37, %v2694_v51  ;;  %v2698_v33 = vsel %vm4470_vm7, %v2696_v11, %v2697_v18 }
  0xb4   : > { %3809 = vmatpush3.bf16.msra.mxu0 %v4050_v46  ;;  %v2688_v46 = vsel %vm4470_vm7, %v3435_v14, %v2687_v25  ;;  %v2738_v25 = vrot.slane %v2736_v15, 4  ;;  %v3453_v45 = vcombine.low %v2695_v2, %v2698_v33  ;;  %v2709_v14 = vsel %vm4470_vm7, %v3438_v38, %v2708_v20 }
  0xb5   : > { %3974 = vmatprep.subr.msk.bf16.mxu0 %vm486_vm0, %v4053_v47  ;;  %v3452_v40 = vcombine.low %v2688_v46, %v2691_v4  ;;  %v2726_v47 = vsel %vm4470_vm7, %v2724_v32, %v2725_v50  ;;  %v3455_v3 = vcombine.low %v2709_v14, %v2712_v9 }
  0xb6   : > { %v3457_v5 = vcombine.low %v2723_v34, %v2726_v47  ;;  %v2740_v26 = vsel %vm4470_vm7, %v2738_v25, %v2739_v36  ;;  %v5122_v34 = vld [vmem:[%s5178_s2] ss:$0 sm:$0xff] }
  0xb7   : > { %3795 = vmatmul.mubr.msk.bf16.gmra.mrb[8].mxu0 %vm461_vm3, %v3411_v44  ;;  %v3459_v29 = vcombine.low %v2737_v53, %v2740_v26 }
  0xb8   : > { %3798 = vmatprep.mubr.msk.bf16.mxu0 %vm461_vm3, %v3412_v61  ;;  %3811 = vmatpush3.bf16.msra.mxu0 %v2827_v62  ;;  %v2705_v62 = vsel %vm4470_vm7, %v2703_v10, %v2704_v28 }
  0xb9   : > { %v3454_v30 = vcombine.low %v2702_v24, %v2705_v62 }
  0xba   : > { %3695 = vmatmul.mubr.msk.bf16.gmra.mrb[12].mxu1 %vm461_vm3, %v4052_v12 }
  0xbb   : > { %3820 = vmatprep.mubr.msk.bf16.mxu1 %vm461_vm3, %v3456_v56 }
  0xbf   : > { %3799 = vmatmul.mubr.msk.bf16.gmra.mrb[12].mxu0 %vm461_vm3, %v3413_v31 }
  0xc0   : > { %3812 = vmatprep.mubr.msk.bf16.mxu0 %vm461_vm3, %v3452_v40 }
  0xc2   : > { %3821 = vmatmul.mubr.msk.bf16.vlgmr.msra.gmra.mrb[16].mxu1 %vm461_vm3, %v3457_v5 }
  0xc3   : > { %3824 = vmatprep.mubr.msk.bf16.mxu1 %vm461_vm3, %v3458_v39 }
  0xc7   : > { %3813 = vmatmul.mubr.msk.bf16.vlgmr.msra.gmra.mrb[0].mxu0 %vm461_vm3, %v3453_v45 }
  0xc8   : > { %3816 = vmatprep.mubr.msk.bf16.mxu0 %vm461_vm3, %v3454_v30 }
  0xca   : > { %3825 = vmatmul.mubr.msk.bf16.gmra.mrb[20].mxu1 %vm461_vm3, %v3459_v29 }
  0xcf   : > { %3817 = vmatmul.mubr.msk.bf16.gmra.mrb[4].mxu0 %vm461_vm3, %v3455_v3 }
 0x175   : > { %v3684_v44 = vpop.f32.mrb[0].mxu1 }
 0x176   : > { %v1217_v61 = vpop.f32.mrb[1].mxu1 }
 0x177   : > { %v3685_v57 = vpop.f32.mrb[2].mxu1 }
 0x178   : > { %v5105_v42 = vpop.f32.mrb[3].mxu1 }
 0x17d   : > { %v5107_v16 = vpop.f32.mrb[4].mxu1 }
 0x17e   : > { %v5109_v17 = vpop.f32.mrb[5].mxu1 }
 0x17f   : > { %v5111_v23 = vpop.f32.mrb[6].mxu1 }
 0x180   : > { %v5113_v49 = vpop.f32.mrb[7].mxu1 }
 0x185   : > { %v3692_v19 = vpop.f32.mrb[8].mxu1 }
 0x186   : > { %v1249_v35 = vpop.f32.mrb[9].mxu1 }
 0x187   : > { %v3693_v43 = vpop.f32.mrb[10].mxu1 }
 0x188   : > { %v1252_v52 = vpop.f32.mrb[11].mxu1 }
 0x18a   : > { %v3796_v32 = vpop.f32.mrb[8].mxu0 }
 0x18b   : > { %v3846_v50 = vadd.f32 %v3796_v32, %v3692_v19  ;;  %v2606_v12 = vpop.f32.mrb[9].mxu0 }
 0x18c   : > { %v3848_v46 = vadd.f32 %v2606_v12, %v1249_v35  ;;  %v3797_v4 = vpop.f32.mrb[10].mxu0 }
 0x18d   : > { %v3850_v48 = vadd.f32 %v3797_v4, %v3693_v43  ;;  %v2609_v56 = vpop.f32.mrb[11].mxu0  ;;  %v3696_v58 = vpop.f32.mrb[12].mxu1 }
 0x18e   : > { %v3852_v51 = vadd.f32 %v2609_v56, %v1252_v52  ;;  %v1265_v54 = vpop.f32.mrb[13].mxu1 }
 0x18f   : > { %v3697_v55 = vpop.f32.mrb[14].mxu1 }
 0x190   : > { %v1268_v27 = vpop.f32.mrb[15].mxu1 }
 0x192   : > { %v3800_v22 = vpop.f32.mrb[12].mxu0 }
 0x193   : > { %v3854_v21 = vadd.f32 %v3800_v22, %v3696_v58  ;;  %v2622_v13 = vpop.f32.mrb[13].mxu0 }
 0x194   : > { %v5115_v40 = vadd.f32 %v2622_v13, %v1265_v54  ;;  %v3801_v37 = vpop.f32.mrb[14].mxu0 }
 0x195   : > { %v5117_v1 = vadd.f32 %v3801_v37, %v3697_v55  ;;  %v2625_v31 = vpop.f32.mrb[15].mxu0  ;;  %v3822_v47 = vpop.f32.mrb[16].mxu1 }
 0x196   : > { %v5124_v15 = vadd.f32 %v2625_v31, %v1268_v27  ;;  %v3847_v11 = vadd.f32 %v3846_v50, %v3822_v47  ;;  %v2895_v18 = vpop.f32.mrb[17].mxu1 }
 0x197   : > { %v3849_v41 = vadd.f32 %v3848_v46, %v2895_v18  ;;  %v3823_v0 = vpop.f32.mrb[18].mxu1 }
 0x198   : > { %v2959_v6 = vadd.f32 %v3847_v11, %v5122_v34  ;;  %v3851_v59 = vadd.f32 %v3850_v48, %v3823_v0  ;;  %v2898_v10 = vpop.f32.mrb[19].mxu1 }
 0x199   : > { %v2957_v28 = vadd.f32 %v3849_v41, %v5122_v34  ;;  %v3853_v5 = vadd.f32 %v3852_v51, %v2898_v10 }
 0x19a   : > { %v3814_v39 = vpop.f32.mrb[0].mxu0  ;;  %vm2975_vm8 = vcmp.ge.f32.partialorder %v2959_v6, 0.0  ;;  %v2991_v60 = vmul.f32 0.01, %v2959_v6  ;;  %v2960_v25 = vadd.f32 %v3851_v59, %v5122_v34 }
 0x19b   : > { %v3838_v36 = vadd.f32 %v3814_v39, %v3684_v44  ;;  %v2863_v2 = vpop.f32.mrb[1].mxu0  ;;  %vm2973_vm9 = vcmp.ge.f32.partialorder %v2957_v28, 0.0  ;;  %v2989_v33 = vmul.f32 0.01, %v2957_v28  ;;  %v2958_v20 = vadd.f32 %v3853_v5, %v5122_v34 }
 0x19c   : > { %v3007_v24 = vsel %vm2975_vm8, %v2959_v6, %v2991_v60  ;;  %v3839_v62 = vadd.f32 %v2863_v2, %v1217_v61  ;;  %v3815_v7 = vpop.f32.mrb[2].mxu0  ;;  %vm2976_vm10 = vcmp.ge.f32.partialorder %v2960_v25, 0.0  ;;  %v2992_v45 = vmul.f32 0.01, %v2960_v25 }
 0x19d   : > { %v2951_v53 = vadd.f32 %v3838_v36, %v5122_v34  ;;  %3023 = vst [vmem:[%s5132_s15 + $0x50] sm:$0xff] %v3007_v24  ;;  %v3005_v26 = vsel %vm2973_vm9, %v2957_v28, %v2989_v33  ;;  %v3840_v30 = vadd.f32 %v3815_v7, %v3685_v57  ;;  %v2866_v38 = vpop.f32.mrb[3].mxu0  ;;  %vm2974_vm11 = vcmp.ge.f32.partialorder %v2958_v20, 0.0  ;;  %v3826_v8 = vpop.f32.mrb[20].mxu1 }
 0x19e   : > { %v2949_v63 = vadd.f32 %v3839_v62, %v5122_v34  ;;  %3021 = vst [vmem:[%s5132_s15 + $0x40] sm:$0xff] %v3005_v26  ;;  %v3008_v29 = vsel %vm2976_vm10, %v2960_v25, %v2992_v45  ;;  %v3841_v14 = vadd.f32 %v2866_v38, %v5105_v42  ;;  %v2990_v9 = vmul.f32 0.01, %v2958_v20  ;;  %v2911_v3 = vpop.f32.mrb[21].mxu1 }
 0x19f   : > { %vm2967_vm12 = vcmp.ge.f32.partialorder %v2951_v53, 0.0  ;;  %v2983_v44 = vmul.f32 0.01, %v2951_v53  ;;  %v2952_v61 = vadd.f32 %v3840_v30, %v5122_v34  ;;  %3024 = vst [vmem:[%s5132_s15 + $0x58] sm:$0xff] %v3008_v29  ;;  %v3855_v19 = vadd.f32 %v3854_v21, %v3826_v8  ;;  %v3827_v57 = vpop.f32.mrb[22].mxu1 }
 0x1a0   : > { %vm2965_vm13 = vcmp.ge.f32.partialorder %v2949_v63, 0.0  ;;  %v2981_v35 = vmul.f32 0.01, %v2949_v63  ;;  %v2950_v43 = vadd.f32 %v3841_v14, %v5122_v34  ;;  %v3006_v52 = vsel %vm2974_vm11, %v2958_v20, %v2990_v9  ;;  %v2914_v32 = vpop.f32.mrb[23].mxu1 }
 0x1a1   : > { %v2999_v42 = vsel %vm2967_vm12, %v2951_v53, %v2983_v44  ;;  %vm2968_vm14 = vcmp.ge.f32.partialorder %v2952_v61, 0.0  ;;  %v2984_v50 = vmul.f32 0.01, %v2952_v61  ;;  %3022 = vst [vmem:[%s5132_s15 + $0x48] sm:$0xff] %v3006_v52  ;;  %v2963_v12 = vadd.f32 %v3855_v19, %v5122_v34 }
 0x1a2   : > { %3015 = vst [vmem:[%s5132_s15 + $0x10] sm:$0xff] %v2999_v42  ;;  %v2997_v46 = vsel %vm2965_vm13, %v2949_v63, %v2981_v35  ;;  %vm2966_vm15 = vcmp.ge.f32.partialorder %v2950_v43, 0.0  ;;  %v2982_v4 = vmul.f32 0.01, %v2950_v43  ;;  %v3818_v48 = vpop.f32.mrb[4].mxu0  ;;  %v3857_v56 = vadd.f32 %v5115_v40, %v2911_v3 }
 0x1a3   : > { %3013 = vst [vmem:[%s5132_s15] sm:$0xff] %v2997_v46  ;;  %v3000_v58 = vsel %vm2968_vm14, %v2952_v61, %v2984_v50  ;;  %v3842_v51 = vadd.f32 %v3818_v48, %v5107_v16  ;;  %vm2979_vm0 = vcmp.ge.f32.partialorder %v2963_v12, 0.0  ;;  %v2995_v54 = vmul.f32 0.01, %v2963_v12  ;;  %v2879_v55 = vpop.f32.mrb[5].mxu0 }
 0x1a4   : > { %3016 = vst [vmem:[%s5132_s15 + $0x18] sm:$0xff] %v3000_v58  ;;  %v2998_v27 = vsel %vm2966_vm15, %v2950_v43, %v2982_v4  ;;  %v3843_v22 = vadd.f32 %v2879_v55, %v5109_v17  ;;  %v2961_v21 = vadd.f32 %v3857_v56, %v5122_v34  ;;  %v3819_v13 = vpop.f32.mrb[6].mxu0  ;;  %v3859_v37 = vadd.f32 %v5117_v1, %v3827_v57 }
 0x1a5   : > { %3014 = vst [vmem:[%s5132_s15 + $0x8] sm:$0xff] %v2998_v27  ;;  %v2955_v40 = vadd.f32 %v3842_v51, %v5122_v34  ;;  %v3011_v31 = vsel %vm2979_vm0, %v2963_v12, %v2995_v54  ;;  %v3844_v47 = vadd.f32 %v3819_v13, %v5111_v23  ;;  %v2882_v16 = vpop.f32.mrb[7].mxu0  ;;  %v3861_v11 = vadd.f32 %v5124_v15, %v2914_v32 }
 0x1a6   : > { %3027 = vst [vmem:[%s5132_s15 + $0x70] sm:$0xff] %v3011_v31  ;;  %v2953_v18 = vadd.f32 %v3843_v22, %v5122_v34  ;;  %vm2977_vm1 = vcmp.ge.f32.partialorder %v2961_v21, 0.0  ;;  %v2993_v17 = vmul.f32 0.01, %v2961_v21  ;;  %v2964_v41 = vadd.f32 %v3859_v37, %v5122_v34 }
 0x1a7   : > { %vm2971_vm2 = vcmp.ge.f32.partialorder %v2955_v40, 0.0  ;;  %v2987_v1 = vmul.f32 0.01, %v2955_v40  ;;  %v2956_v0 = vadd.f32 %v3844_v47, %v5122_v34  ;;  %v3845_v6 = vadd.f32 %v2882_v16, %v5113_v49 }
 0x1a8   : > { %vm2969_vm3 = vcmp.ge.f32.partialorder %v2953_v18, 0.0  ;;  %v2985_v23 = vmul.f32 0.01, %v2953_v18  ;;  %v3009_v15 = vsel %vm2977_vm1, %v2961_v21, %v2993_v17  ;;  %vm2980_vm4 = vcmp.ge.f32.partialorder %v2964_v41, 0.0 }
 0x1a9   : > { %v3003_v59 = vsel %vm2971_vm2, %v2955_v40, %v2987_v1  ;;  %3025 = vst [vmem:[%s5132_s15 + $0x60] sm:$0xff] %v3009_v15  ;;  %vm2972_vm5 = vcmp.ge.f32.partialorder %v2956_v0, 0.0  ;;  %v2988_v10 = vmul.f32 0.01, %v2956_v0  ;;  %v2996_v28 = vmul.f32 0.01, %v2964_v41 }
 0x1aa   : > { %3019 = vst [vmem:[%s5132_s15 + $0x30] sm:$0xff] %v3003_v59  ;;  %v3001_v5 = vsel %vm2969_vm3, %v2953_v18, %v2985_v23  ;;  %v2954_v39 = vadd.f32 %v3845_v6, %v5122_v34  ;;  %v2962_v60 = vadd.f32 %v3861_v11, %v5122_v34 }
 0x1ab   : > { %3017 = vst [vmem:[%s5132_s15 + $0x20] sm:$0xff] %v3001_v5  ;;  %v3004_v49 = vsel %vm2972_vm5, %v2956_v0, %v2988_v10  ;;  %v3012_v25 = vsel %vm2980_vm4, %v2964_v41, %v2996_v28 }
 0x1ac   : > { %3020 = vst [vmem:[%s5132_s15 + $0x38] sm:$0xff] %v3004_v49  ;;  %3028 = vst [vmem:[%s5132_s15 + $0x78] sm:$0xff] %v3012_v25  ;;  %vm2970_vm6 = vcmp.ge.f32.partialorder %v2954_v39, 0.0  ;;  %v2986_v36 = vmul.f32 0.01, %v2954_v39  ;;  %vm2978_vm7 = vcmp.ge.f32.partialorder %v2962_v60, 0.0 }
 0x1ad   : > { %v2994_v2 = vmul.f32 0.01, %v2962_v60 }
 0x1ae   : > { %v3002_v33 = vsel %vm2970_vm6, %v2954_v39, %v2986_v36 }
 0x1af   : > { %v3010_v20 = vsel %vm2978_vm7, %v2962_v60, %v2994_v2  ;;  %3018 = vst [vmem:[%s5132_s15 + $0x28] sm:$0xff] %v3002_v33 }
 0x1b0   : > { %3026 = vst [vmem:[%s5132_s15 + $0x68] sm:$0xff] %v3010_v20 }
 0x1b1 PF: > { %s13_s12 = sadd.s32 1, %s4063_s12  }
 0x1b2   : > { %p10_p4 = scmp.ge.s32.totalorder %s13_s12, 4  }
 0x1b4   :  { %12 = sbr.rel (!%p10_p4) target bundleno = 1 (0x1), region = 72 }

</bundles_post_ra>
